<compile_context>
chip_gen: v6e
topology: v6e:2x2x1
jax: 0.10.0
libtpu: 0.0.40
codegen_flags: <defaults>
</compile_context>

<pallas_src>
import jax
import jax.numpy as jnp
from jax.experimental import pallas as pl
from jax.experimental.pallas import tpu as pltpu


def _gelu(x):
    # matches torch.nn.GELU(approximate='tanh')
    c = jnp.asarray(0.7978845608028654, x.dtype)  # sqrt(2/pi)
    return 0.5 * x * (1.0 + jnp.tanh(c * (x + 0.044715 * x * x * x)))


def _make_mbconv_kernel(H, W):
    """Build the fused kernel for a fixed (H, W) spatial resolution."""

    def kernel(mask_ref, x_ref, w1_ref, w3_ref, pk_ref, o_ref):
        # grid = (image n [parallel], block d [arbitrary, innermost])
        d = pl.program_id(1)

        # On the first block of each image, seed the resident output block.
        @pl.when(d == 0)
        def _():
            o_ref[...] = x_ref[...]

        C, HW = o_ref.shape            # (dim, H*W)   e.g. (8, 256)
        Ch = w1_ref.shape[0]           # hidden dim   e.g. 32

        x = o_ref[...]                 # f32 activation from previous block, (C, HW)
        mk = mask_ref[...]             # f32 (9, HW) precomputed boundary masks
        pk = pk_ref[...]               # f32 (Ch, 12) packed small params
        b1 = pk[:, 0:1]                # (Ch, 1)
        wd = pk[:, 1:10]               # (Ch, 9)  depthwise taps
        bd = pk[:, 10:11]              # (Ch, 1)
        b3 = pk[:C, 11:12]             # (C, 1)   (zero-padded rows beyond C)

        # --- 1) 1x1 expand conv (+ folded BN) + GELU ---------------------------
        # bf16 MXU inputs, f32 accumulate.
        h1 = jnp.dot(w1_ref[...], x.astype(jnp.bfloat16),
                     preferred_element_type=jnp.float32) + b1
        h1 = _gelu(h1)                                            # (Ch, HW) f32

        # --- 2) 3x3 depthwise conv (pad=1, + folded BN) + GELU, in registers ---
        # TODO(synk): run this tap loop / GELU in bf16 on v6e/v7x only (2x VPU/EUP,
        # half the vreg pressure); kept f32 here so v5e stays convert-free.
        acc = h1 * wd[:, 4:5]          # center tap (dy=0, dx=0)
        for dy in (-1, 0, 1):
            for dx in (-1, 0, 1):
                if dy == 0 and dx == 0:
                    continue
                k = (dy + 1) * 3 + (dx + 1)
                off = dy * W + dx
                # out[p] = h1[p + off]  (lane rotation on the XLU, per-image tile)
                shifted = pltpu.roll(h1, shift=(-off) % HW, axis=1)
                acc = acc + (shifted * mk[k:k + 1, :]) * wd[:, k:k + 1]
        h2 = _gelu(acc + bd)                                      # (Ch, HW) f32

        # --- 3) 1x1 project conv (+ folded BN) + residual + GELU ---------------
        h3 = jnp.dot(w3_ref[...], h2.astype(jnp.bfloat16),
                     preferred_element_type=jnp.float32) + b3
        o_ref[...] = _gelu(h3 + x).astype(o_ref.dtype)

    return kernel


def _make_tap_masks(H, W):
    """(9, H*W) f32 boundary masks, one per 3x3 tap (center = all ones)."""
    pos = jnp.arange(H * W)
    row = pos // W
    col = pos % W
    masks = []
    for dy in (-1, 0, 1):
        for dx in (-1, 0, 1):
            m = jnp.ones((H * W,), dtype=bool)
            if dy == -1:
                m = m & (row >= 1)
            if dy == 1:
                m = m & (row < H - 1)
            if dx == -1:
                m = m & (col >= 1)
            if dx == 1:
                m = m & (col < W - 1)
            masks.append(m)
    return jnp.stack(masks).astype(jnp.float32)


def mbconv_block_module(x_nchw, kernel_params, *, H, W):
    """Full MBConvBlock.forward (depth blocks, no downsample). NCHW in/out."""
    N, C, H_, W_ = x_nchw.shape
    assert (H_, W_) == (H, W)
    HW = H * W
    assert HW % 128 == 0, "per-image lane width must be a multiple of 128"

    w1, w3, packed = kernel_params      # (depth,Ch,C) bf16, (depth,C,Ch) bf16, (depth,Ch,12) f32
    depth, Ch, _ = w1.shape

    x3 = x_nchw.reshape(N, C, HW)       # free contiguous reshape (no transpose)
    masks = _make_tap_masks(H, W)

    y3 = pl.pallas_call(
        _make_mbconv_kernel(H, W),
        out_shape=jax.ShapeDtypeStruct((N, C, HW), x_nchw.dtype),
        grid_spec=pltpu.PrefetchScalarGridSpec(
            num_scalar_prefetch=0,
            grid=(N, depth),
            in_specs=[
                pl.BlockSpec((9, HW), lambda n, d: (0, 0)),          # masks (resident)
                pl.BlockSpec((None, C, HW), lambda n, d: (n, 0, 0)), # x (per image)
                pl.BlockSpec((None, Ch, C), lambda n, d: (d, 0, 0)), # w1 (per block, bf16)
                pl.BlockSpec((None, C, Ch), lambda n, d: (d, 0, 0)), # w3 (per block, bf16)
                pl.BlockSpec((None, Ch, 12), lambda n, d: (d, 0, 0)),# packed b1|wd|bd|b3
            ],
            # Constant block index across the (inner) depth axis -> activation
            # stays resident in VMEM for all blocks of one image.
            out_specs=pl.BlockSpec((None, C, HW), lambda n, d: (n, 0, 0)),
        ),
        compiler_params=pltpu.CompilerParams(
            dimension_semantics=("parallel", "arbitrary"),
            vmem_limit_bytes=32 * 1024 * 1024),
    )(masks, x3, w1, w3, packed)
    return y3.reshape(N, C, H, W)


# ----------------------------- parameter setup ------------------------------

def _fold_bn(gamma, beta, mean, var, eps=1e-5):
    scale = gamma / jnp.sqrt(var + eps)
    shift = beta - mean * scale
    return scale, shift


def make_mbconv_params(key, dim, conv_expand_ratio=4.0):
    """Deterministic synthetic Conv2d_BN params (BN folded into conv), f32.

    Layouts: w1 (Ch, C), b1 (Ch, 1), wd (Ch, 9), bd (Ch, 1), w3 (C, Ch), b3 (C, 1)
    """
    C = dim
    Ch = int(C * conv_expand_ratio)
    k = jax.random.split(key, 15)

    def bn(kg, kb, km, kv, n):
        g = 1.0 + 0.1 * jax.random.normal(kg, (n,), jnp.float32)
        b = 0.1 * jax.random.normal(kb, (n,), jnp.float32)
        m = 0.1 * jax.random.normal(km, (n,), jnp.float32)
        v = jnp.abs(jax.random.normal(kv, (n,), jnp.float32)) + 0.5
        return _fold_bn(g, b, m, v)

    # conv1: 1x1, C -> Ch  (no conv bias; BN follows)
    w1 = jax.random.normal(k[0], (Ch, C), jnp.float32) / jnp.sqrt(C)
    s1, sh1 = bn(k[1], k[2], k[3], k[4], Ch)
    w1f, b1f = w1 * s1[:, None], sh1[:, None]

    # conv2: 3x3 depthwise on Ch channels
    wd = jax.random.normal(k[5], (Ch, 9), jnp.float32) / 3.0
    s2, sh2 = bn(k[6], k[7], k[8], k[9], Ch)
    wdf, bdf = wd * s2[:, None], sh2[:, None]

    # conv3: 1x1, Ch -> C (bn_weight_init=0 in the original; nonzero synthetic
    # init keeps the compute path non-trivial)
    w3 = jax.random.normal(k[10], (C, Ch), jnp.float32) / jnp.sqrt(Ch)
    s3, sh3 = bn(k[11], k[12], k[13], k[14], C)
    w3f, b3f = w3 * s3[:, None], sh3[:, None]

    return (w1f, b1f, wdf, bdf, w3f, b3f)


def pack_params_for_kernel(params_list):
    """Stack per-block params across depth; bf16 matmul weights, packed smalls."""
    w1 = jnp.stack([p[0] for p in params_list]).astype(jnp.bfloat16)  # (depth, Ch, C)
    w3 = jnp.stack([p[4] for p in params_list]).astype(jnp.bfloat16)  # (depth, C, Ch)
    packed = []
    for (w1f, b1f, wdf, bdf, w3f, b3f) in params_list:
        Ch = w1f.shape[0]
        C = w3f.shape[0]
        b3pad = jnp.zeros((Ch, 1), jnp.float32).at[:C].set(b3f)
        packed.append(jnp.concatenate([b1f, wdf, bdf, b3pad], axis=1))  # (Ch, 12)
    packed = jnp.stack(packed)                                          # (depth, Ch, 12)
    return w1, w3, packed


# ------------------------------ JAX reference --------------------------------

def mbconv_block_ref(x_nhwc, params):
    w1, b1, wd, bd, w3, b3 = params
    N, H, W, C = x_nhwc.shape
    h1 = _gelu(jnp.einsum('nhwc,dc->nhwd', x_nhwc, w1) + b1[:, 0])
    xp = jnp.pad(h1, ((0, 0), (1, 1), (1, 1), (0, 0)))
    acc = jnp.zeros_like(h1)
    for dy in range(3):
        for dx in range(3):
            acc = acc + xp[:, dy:dy + H, dx:dx + W, :] * wd[:, dy * 3 + dx]
    h2 = _gelu(acc + bd[:, 0])
    h3 = jnp.einsum('nhwd,cd->nhwc', h2, w3) + b3[:, 0]
    return _gelu(h3 + x_nhwc)


# ----------------------------------- main ------------------------------------

if __name__ == "__main__":
    # MBConvBlock(dim=8, resolution=16, depth=2, activation=GELU(tanh),
    #             drop_path=0.0, downsample=None, conv_expand_ratio=4.0)
    N, C, H, W = 2, 8, 16, 16
    depth = 2
    conv_expand_ratio = 4.0

    key = jax.random.PRNGKey(0)
    kx, kp = jax.random.split(key)
    x_nchw = jax.random.normal(kx, (N, C, H, W), jnp.float32)
    params_list = [make_mbconv_params(kk, C, conv_expand_ratio)
                   for kk in jax.random.split(kp, depth)]
    kernel_params = pack_params_for_kernel(params_list)

    # Pallas path: one fused pallas_call over (batch x depth)
    y_nchw = jax.block_until_ready(
        mbconv_block_module(x_nchw, kernel_params, H=H, W=W))

    # Pure-JAX f32 reference for validation (kernel uses bf16 MXU inputs, so
    # tolerance is relaxed vs the previous all-f32 version).
    xr = jnp.transpose(x_nchw, (0, 2, 3, 1))
    for p in params_list:
        xr = mbconv_block_ref(xr, p)
    y_ref = jnp.transpose(xr, (0, 3, 1, 2))

    err = float(jnp.max(jnp.abs(y_nchw - y_ref)))
    assert y_nchw.shape == (N, C, H, W)
    assert err < 5e-2, f"max abs err = {err}"
    # TODO(synk): stochastic drop_path (training mode) and the optional
    # PatchMerging downsample are not part of this kernel (downsample=None,
    # drop_path=0.0 inference semantics reproduced).
    print("KERNEL_OK")
</pallas_src>

<mosaic_0001>
module attributes {stable_mosaic.version = 11 : i64} {
  func.func @kernel(%arg0: i32, %arg1: i32, %arg2: memref<9x256xf32, #tpu.memory_space<vmem>>, %arg3: memref<1x8x256xf32, #tpu.memory_space<vmem>>, %arg4: memref<1x32x8xbf16, #tpu.memory_space<vmem>>, %arg5: memref<1x8x32xbf16, #tpu.memory_space<vmem>>, %arg6: memref<1x32x12xf32, #tpu.memory_space<vmem>>, %arg7: memref<1x8x256xf32, #tpu.memory_space<vmem>>) attributes {dimension_semantics = [#tpu.dimension_semantics<parallel>, #tpu.dimension_semantics<arbitrary>], iteration_bounds = array<i64: 2, 2>, scalar_prefetch = 0 : i64, scratch_operands = 0 : i64, tpu.core_type = #tpu.core_type<tc>, window_params = [{pipeline_mode = #tpu.pipeline_mode<synchronous>, transform_indices = @transform_0, window_bounds = array<i64: 9, 256>}, {transform_indices = @transform_1, window_bounds = array<i64: 1, 8, 256>}, {transform_indices = @transform_2, window_bounds = array<i64: 1, 32, 8>}, {transform_indices = @transform_3, window_bounds = array<i64: 1, 8, 32>}, {transform_indices = @transform_4, window_bounds = array<i64: 1, 32, 12>}, {transform_indices = @transform_5, window_bounds = array<i64: 1, 8, 256>}]} {
    %c0_i32 = arith.constant 0 : i32
    %0 = arith.cmpi eq, %arg1, %c0_i32 : i32
    %1 = arith.extui %0 : i1 to i32
    %c0_i32_0 = arith.constant 0 : i32
    %2 = arith.cmpi ne, %1, %c0_i32_0 : i32
    scf.if %2 {
      %c0_30 = arith.constant 0 : index
      %c0_31 = arith.constant 0 : index
      %c0_32 = arith.constant 0 : index
      %136 = vector.load %arg3[%c0_30, %c0_31, %c0_32] : memref<1x8x256xf32, #tpu.memory_space<vmem>>, vector<1x8x256xf32>
      %137 = vector.shape_cast %136 : vector<1x8x256xf32> to vector<8x256xf32>
      %c0_33 = arith.constant 0 : index
      %c0_34 = arith.constant 0 : index
      %c0_35 = arith.constant 0 : index
      %138 = vector.load %arg7[%c0_33, %c0_34, %c0_35] : memref<1x8x256xf32, #tpu.memory_space<vmem>>, vector<1x8x256xf32>
      %139 = vector.shape_cast %138 : vector<1x8x256xf32> to vector<8x256xf32>
      %140 = vector.shape_cast %137 : vector<8x256xf32> to vector<1x8x256xf32>
      tpu.vector_store %arg7[%c0_33, %c0_34, %c0_35], %140 {strides = array<i32>} : memref<1x8x256xf32, #tpu.memory_space<vmem>>, vector<1x8x256xf32>,
    } else {
    }
    %c0 = arith.constant 0 : index
    %c0_1 = arith.constant 0 : index
    %c0_2 = arith.constant 0 : index
    %3 = vector.load %arg7[%c0, %c0_1, %c0_2] : memref<1x8x256xf32, #tpu.memory_space<vmem>>, vector<1x8x256xf32>
    %4 = vector.shape_cast %3 : vector<1x8x256xf32> to vector<8x256xf32>
    %c0_3 = arith.constant 0 : index
    %c0_4 = arith.constant 0 : index
    %5 = vector.load %arg2[%c0_3, %c0_4] : memref<9x256xf32, #tpu.memory_space<vmem>>, vector<9x256xf32>
    %c0_5 = arith.constant 0 : index
    %c0_6 = arith.constant 0 : index
    %c0_7 = arith.constant 0 : index
    %6 = vector.load %arg6[%c0_5, %c0_6, %c0_7] : memref<1x32x12xf32, #tpu.memory_space<vmem>>, vector<1x32x12xf32>
    %7 = vector.shape_cast %6 : vector<1x32x12xf32> to vector<32x12xf32>
    %8 = vector.extract_strided_slice %7 {offsets = [0, 0], sizes = [32, 1], strides = [1, 1]} : vector<32x12xf32> to vector<32x1xf32>
    %9 = vector.extract_strided_slice %7 {offsets = [0, 1], sizes = [32, 9], strides = [1, 1]} : vector<32x12xf32> to vector<32x9xf32>
    %10 = vector.extract_strided_slice %7 {offsets = [0, 10], sizes = [32, 1], strides = [1, 1]} : vector<32x12xf32> to vector<32x1xf32>
    %11 = vector.extract_strided_slice %7 {offsets = [0, 11], sizes = [8, 1], strides = [1, 1]} : vector<32x12xf32> to vector<8x1xf32>
    %c0_8 = arith.constant 0 : index
    %c0_9 = arith.constant 0 : index
    %c0_10 = arith.constant 0 : index
    %12 = vector.load %arg4[%c0_8, %c0_9, %c0_10] : memref<1x32x8xbf16, #tpu.memory_space<vmem>>, vector<1x32x8xbf16>
    %13 = vector.shape_cast %12 : vector<1x32x8xbf16> to vector<32x8xbf16>
    %14 = arith.truncf %4 : vector<8x256xf32> to vector<8x256xbf16>
    %cst = arith.constant dense<0.000000e+00> : vector<32x256xf32>
    %15 = tpu.matmul %13, %14, %cst {dimension_numbers = #tpu.dot_dimension_numbers<[1], [0], [0], [1], [0, 0, 1, 1], [], []>} : vector<32x8xbf16>, vector<8x256xbf16>, vector<32x256xf32> -> vector<32x256xf32>
    %16 = vector.broadcast %8 : vector<32x1xf32> to vector<32x256xf32>
    %17 = arith.addf %15, %16 : vector<32x256xf32>
    %cst_11 = arith.constant 5.000000e-01 : f32
    %18 = vector.broadcast %cst_11 : f32 to vector<32x256xf32>
    %19 = arith.mulf %18, %17 : vector<32x256xf32>
    %cst_12 = arith.constant 4.471500e-02 : f32
    %20 = vector.broadcast %cst_12 : f32 to vector<32x256xf32>
    %21 = arith.mulf %20, %17 : vector<32x256xf32>
    %22 = arith.mulf %21, %17 : vector<32x256xf32>
    %23 = arith.mulf %22, %17 : vector<32x256xf32>
    %24 = arith.addf %17, %23 : vector<32x256xf32>
    %cst_13 = arith.constant 0.797884583 : f32
    %25 = vector.broadcast %cst_13 : f32 to vector<32x256xf32>
    %26 = arith.mulf %25, %24 : vector<32x256xf32>
    %27 = math.tanh %26 : vector<32x256xf32>
    %cst_14 = arith.constant 1.000000e+00 : f32
    %28 = vector.broadcast %cst_14 : f32 to vector<32x256xf32>
    %29 = arith.addf %28, %27 : vector<32x256xf32>
    %30 = arith.mulf %19, %29 : vector<32x256xf32>
    %31 = vector.extract_strided_slice %9 {offsets = [0, 4], sizes = [32, 1], strides = [1, 1]} : vector<32x9xf32> to vector<32x1xf32>
    %32 = vector.broadcast %31 : vector<32x1xf32> to vector<32x256xf32>
    %33 = arith.mulf %30, %32 : vector<32x256xf32>
    %c17_i32 = arith.constant 17 : i32
    %34 = tpu.dynamic_rotate %30 by %c17_i32 dim 1 : vector<32x256xf32>, i32 -> vector<32x256xf32>
    %35 = vector.extract_strided_slice %5 {offsets = [0, 0], sizes = [1, 256], strides = [1, 1]} : vector<9x256xf32> to vector<1x256xf32>
    %36 = vector.broadcast %35 : vector<1x256xf32> to vector<32x256xf32>
    %37 = arith.mulf %34, %36 : vector<32x256xf32>
    %38 = vector.extract_strided_slice %9 {offsets = [0, 0], sizes = [32, 1], strides = [1, 1]} : vector<32x9xf32> to vector<32x1xf32>
    %39 = vector.broadcast %38 : vector<32x1xf32> to vector<32x256xf32>
    %40 = arith.mulf %37, %39 : vector<32x256xf32>
    %41 = arith.addf %33, %40 : vector<32x256xf32>
    %c16_i32 = arith.constant 16 : i32
    %42 = tpu.dynamic_rotate %30 by %c16_i32 dim 1 : vector<32x256xf32>, i32 -> vector<32x256xf32>
    %43 = vector.extract_strided_slice %5 {offsets = [1, 0], sizes = [1, 256], strides = [1, 1]} : vector<9x256xf32> to vector<1x256xf32>
    %44 = vector.broadcast %43 : vector<1x256xf32> to vector<32x256xf32>
    %45 = arith.mulf %42, %44 : vector<32x256xf32>
    %46 = vector.extract_strided_slice %9 {offsets = [0, 1], sizes = [32, 1], strides = [1, 1]} : vector<32x9xf32> to vector<32x1xf32>
    %47 = vector.broadcast %46 : vector<32x1xf32> to vector<32x256xf32>
    %48 = arith.mulf %45, %47 : vector<32x256xf32>
    %49 = arith.addf %41, %48 : vector<32x256xf32>
    %c15_i32 = arith.constant 15 : i32
    %50 = tpu.dynamic_rotate %30 by %c15_i32 dim 1 : vector<32x256xf32>, i32 -> vector<32x256xf32>
    %51 = vector.extract_strided_slice %5 {offsets = [2, 0], sizes = [1, 256], strides = [1, 1]} : vector<9x256xf32> to vector<1x256xf32>
    %52 = vector.broadcast %51 : vector<1x256xf32> to vector<32x256xf32>
    %53 = arith.mulf %50, %52 : vector<32x256xf32>
    %54 = vector.extract_strided_slice %9 {offsets = [0, 2], sizes = [32, 1], strides = [1, 1]} : vector<32x9xf32> to vector<32x1xf32>
    %55 = vector.broadcast %54 : vector<32x1xf32> to vector<32x256xf32>
    %56 = arith.mulf %53, %55 : vector<32x256xf32>
    %57 = arith.addf %49, %56 : vector<32x256xf32>
    %c1_i32 = arith.constant 1 : i32
    %58 = tpu.dynamic_rotate %30 by %c1_i32 dim 1 : vector<32x256xf32>, i32 -> vector<32x256xf32>
    %59 = vector.extract_strided_slice %5 {offsets = [3, 0], sizes = [1, 256], strides = [1, 1]} : vector<9x256xf32> to vector<1x256xf32>
    %60 = vector.broadcast %59 : vector<1x256xf32> to vector<32x256xf32>
    %61 = arith.mulf %58, %60 : vector<32x256xf32>
    %62 = vector.extract_strided_slice %9 {offsets = [0, 3], sizes = [32, 1], strides = [1, 1]} : vector<32x9xf32> to vector<32x1xf32>
    %63 = vector.broadcast %62 : vector<32x1xf32> to vector<32x256xf32>
    %64 = arith.mulf %61, %63 : vector<32x256xf32>
    %65 = arith.addf %57, %64 : vector<32x256xf32>
    %c255_i32 = arith.constant 255 : i32
    %66 = tpu.dynamic_rotate %30 by %c255_i32 dim 1 : vector<32x256xf32>, i32 -> vector<32x256xf32>
    %67 = vector.extract_strided_slice %5 {offsets = [5, 0], sizes = [1, 256], strides = [1, 1]} : vector<9x256xf32> to vector<1x256xf32>
    %68 = vector.broadcast %67 : vector<1x256xf32> to vector<32x256xf32>
    %69 = arith.mulf %66, %68 : vector<32x256xf32>
    %70 = vector.extract_strided_slice %9 {offsets = [0, 5], sizes = [32, 1], strides = [1, 1]} : vector<32x9xf32> to vector<32x1xf32>
    %71 = vector.broadcast %70 : vector<32x1xf32> to vector<32x256xf32>
    %72 = arith.mulf %69, %71 : vector<32x256xf32>
    %73 = arith.addf %65, %72 : vector<32x256xf32>
    %c241_i32 = arith.constant 241 : i32
    %74 = tpu.dynamic_rotate %30 by %c241_i32 dim 1 : vector<32x256xf32>, i32 -> vector<32x256xf32>
    %75 = vector.extract_strided_slice %5 {offsets = [6, 0], sizes = [1, 256], strides = [1, 1]} : vector<9x256xf32> to vector<1x256xf32>
    %76 = vector.broadcast %75 : vector<1x256xf32> to vector<32x256xf32>
    %77 = arith.mulf %74, %76 : vector<32x256xf32>
    %78 = vector.extract_strided_slice %9 {offsets = [0, 6], sizes = [32, 1], strides = [1, 1]} : vector<32x9xf32> to vector<32x1xf32>
    %79 = vector.broadcast %78 : vector<32x1xf32> to vector<32x256xf32>
    %80 = arith.mulf %77, %79 : vector<32x256xf32>
    %81 = arith.addf %73, %80 : vector<32x256xf32>
    %c240_i32 = arith.constant 240 : i32
    %82 = tpu.dynamic_rotate %30 by %c240_i32 dim 1 : vector<32x256xf32>, i32 -> vector<32x256xf32>
    %83 = vector.extract_strided_slice %5 {offsets = [7, 0], sizes = [1, 256], strides = [1, 1]} : vector<9x256xf32> to vector<1x256xf32>
    %84 = vector.broadcast %83 : vector<1x256xf32> to vector<32x256xf32>
    %85 = arith.mulf %82, %84 : vector<32x256xf32>
    %86 = vector.extract_strided_slice %9 {offsets = [0, 7], sizes = [32, 1], strides = [1, 1]} : vector<32x9xf32> to vector<32x1xf32>
    %87 = vector.broadcast %86 : vector<32x1xf32> to vector<32x256xf32>
    %88 = arith.mulf %85, %87 : vector<32x256xf32>
    %89 = arith.addf %81, %88 : vector<32x256xf32>
    %c239_i32 = arith.constant 239 : i32
    %90 = tpu.dynamic_rotate %30 by %c239_i32 dim 1 : vector<32x256xf32>, i32 -> vector<32x256xf32>
    %91 = vector.extract_strided_slice %5 {offsets = [8, 0], sizes = [1, 256], strides = [1, 1]} : vector<9x256xf32> to vector<1x256xf32>
    %92 = vector.broadcast %91 : vector<1x256xf32> to vector<32x256xf32>
    %93 = arith.mulf %90, %92 : vector<32x256xf32>
    %94 = vector.extract_strided_slice %9 {offsets = [0, 8], sizes = [32, 1], strides = [1, 1]} : vector<32x9xf32> to vector<32x1xf32>
    %95 = vector.broadcast %94 : vector<32x1xf32> to vector<32x256xf32>
    %96 = arith.mulf %93, %95 : vector<32x256xf32>
    %97 = arith.addf %89, %96 : vector<32x256xf32>
    %98 = vector.broadcast %10 : vector<32x1xf32> to vector<32x256xf32>
    %99 = arith.addf %97, %98 : vector<32x256xf32>
    %cst_15 = arith.constant 5.000000e-01 : f32
    %100 = vector.broadcast %cst_15 : f32 to vector<32x256xf32>
    %101 = arith.mulf %100, %99 : vector<32x256xf32>
    %cst_16 = arith.constant 4.471500e-02 : f32
    %102 = vector.broadcast %cst_16 : f32 to vector<32x256xf32>
    %103 = arith.mulf %102, %99 : vector<32x256xf32>
    %104 = arith.mulf %103, %99 : vector<32x256xf32>
    %105 = arith.mulf %104, %99 : vector<32x256xf32>
    %106 = arith.addf %99, %105 : vector<32x256xf32>
    %cst_17 = arith.constant 0.797884583 : f32
    %107 = vector.broadcast %cst_17 : f32 to vector<32x256xf32>
    %108 = arith.mulf %107, %106 : vector<32x256xf32>
    %109 = math.tanh %108 : vector<32x256xf32>
    %cst_18 = arith.constant 1.000000e+00 : f32
    %110 = vector.broadcast %cst_18 : f32 to vector<32x256xf32>
    %111 = arith.addf %110, %109 : vector<32x256xf32>
    %112 = arith.mulf %101, %111 : vector<32x256xf32>
    %c0_19 = arith.constant 0 : index
    %c0_20 = arith.constant 0 : index
    %c0_21 = arith.constant 0 : index
    %113 = vector.load %arg5[%c0_19, %c0_20, %c0_21] : memref<1x8x32xbf16, #tpu.memory_space<vmem>>, vector<1x8x32xbf16>
    %114 = vector.shape_cast %113 : vector<1x8x32xbf16> to vector<8x32xbf16>
    %115 = arith.truncf %112 : vector<32x256xf32> to vector<32x256xbf16>
    %cst_22 = arith.constant dense<0.000000e+00> : vector<8x256xf32>
    %116 = tpu.matmul %114, %115, %cst_22 {dimension_numbers = #tpu.dot_dimension_numbers<[1], [0], [0], [1], [0, 0, 1, 1], [], []>} : vector<8x32xbf16>, vector<32x256xbf16>, vector<8x256xf32> -> vector<8x256xf32>
    %117 = vector.broadcast %11 : vector<8x1xf32> to vector<8x256xf32>
    %118 = arith.addf %116, %117 : vector<8x256xf32>
    %119 = arith.addf %118, %4 : vector<8x256xf32>
    %cst_23 = arith.constant 5.000000e-01 : f32
    %120 = vector.broadcast %cst_23 : f32 to vector<8x256xf32>
    %121 = arith.mulf %120, %119 : vector<8x256xf32>
    %cst_24 = arith.constant 4.471500e-02 : f32
    %122 = vector.broadcast %cst_24 : f32 to vector<8x256xf32>
    %123 = arith.mulf %122, %119 : vector<8x256xf32>
    %124 = arith.mulf %123, %119 : vector<8x256xf32>
    %125 = arith.mulf %124, %119 : vector<8x256xf32>
    %126 = arith.addf %119, %125 : vector<8x256xf32>
    %cst_25 = arith.constant 0.797884583 : f32
    %127 = vector.broadcast %cst_25 : f32 to vector<8x256xf32>
    %128 = arith.mulf %127, %126 : vector<8x256xf32>
    %129 = math.tanh %128 : vector<8x256xf32>
    %cst_26 = arith.constant 1.000000e+00 : f32
    %130 = vector.broadcast %cst_26 : f32 to vector<8x256xf32>
    %131 = arith.addf %130, %129 : vector<8x256xf32>
    %132 = arith.mulf %121, %131 : vector<8x256xf32>
    %c0_27 = arith.constant 0 : index
    %c0_28 = arith.constant 0 : index
    %c0_29 = arith.constant 0 : index
    %133 = vector.load %arg7[%c0_27, %c0_28, %c0_29] : memref<1x8x256xf32, #tpu.memory_space<vmem>>, vector<1x8x256xf32>
    %134 = vector.shape_cast %133 : vector<1x8x256xf32> to vector<8x256xf32>
    %135 = vector.shape_cast %132 : vector<8x256xf32> to vector<1x8x256xf32>
    tpu.vector_store %arg7[%c0_27, %c0_28, %c0_29], %135 {strides = array<i32>} : memref<1x8x256xf32, #tpu.memory_space<vmem>>, vector<1x8x256xf32>,
    return
  }
  func.func @transform_0(%arg0: i32, %arg1: i32) -> (i32, i32) {
    %c0_i32 = arith.constant 0 : i32
    %c0_i32_0 = arith.constant 0 : i32
    %c0_i32_1 = arith.constant 0 : i32
    return %c0_i32, %c0_i32_0 : i32, i32
  }
  func.func @transform_1(%arg0: i32, %arg1: i32) -> (i32, i32, i32) {
    %c0_i32 = arith.constant 0 : i32
    %c0_i32_0 = arith.constant 0 : i32
    %c0_i32_1 = arith.constant 0 : i32
    return %arg0, %c0_i32, %c0_i32_0 : i32, i32, i32
  }
  func.func @transform_2(%arg0: i32, %arg1: i32) -> (i32, i32, i32) {
    %c0_i32 = arith.constant 0 : i32
    %c0_i32_0 = arith.constant 0 : i32
    %c0_i32_1 = arith.constant 0 : i32
    return %arg1, %c0_i32, %c0_i32_0 : i32, i32, i32
  }
  func.func @transform_3(%arg0: i32, %arg1: i32) -> (i32, i32, i32) {
    %c0_i32 = arith.constant 0 : i32
    %c0_i32_0 = arith.constant 0 : i32
    %c0_i32_1 = arith.constant 0 : i32
    return %arg1, %c0_i32, %c0_i32_0 : i32, i32, i32
  }
  func.func @transform_4(%arg0: i32, %arg1: i32) -> (i32, i32, i32) {
    %c0_i32 = arith.constant 0 : i32
    %c0_i32_0 = arith.constant 0 : i32
    %c0_i32_1 = arith.constant 0 : i32
    return %arg1, %c0_i32, %c0_i32_0 : i32, i32, i32
  }
  func.func @transform_5(%arg0: i32, %arg1: i32) -> (i32, i32, i32) {
    %c0_i32 = arith.constant 0 : i32
    %c0_i32_0 = arith.constant 0 : i32
    %c0_i32_1 = arith.constant 0 : i32
    return %arg0, %c0_i32, %c0_i32_0 : i32, i32, i32
  }
}

</mosaic_0001>

<bundles_post_ra>
// kernel: tpu_custom_call.1
= control target key start
LH: loop header
LB: loop body
LE: loop exit
PB: predicated region body
PF: predicated region fallthrough
CT: control target
= control target key end

     0   :  { %10 = vsyncpa [#allocation3], 0  ;;  %s2613_s0 = inlined_call_operand.vmem [shape: f32[9,256], index: 0, kind: input, shape index: {}]   ;;  %s2614_s1 = inlined_call_operand.vmem [shape: f32[2,8,256], index: 1, kind: input, shape index: {}]   ;;  %s2615_s2 = inlined_call_operand.vmem [shape: bf16[2,32,8], index: 2, kind: input, shape index: {}]   ;;  %s2616_s3 = inlined_call_operand.vmem [shape: bf16[2,8,32], index: 3, kind: input, shape index: {}]   ;;  %s2617_s4 = inlined_call_operand.vmem [shape: f32[2,32,12], index: 4, kind: input, shape index: {}]   ;;  %s2618_s5 = inlined_call_operand.hbm [shape: f32[2,8,256], index: 5, kind: output, shape index: {}]  }
   0x1   :  { %12 = vsyncpa [#allocation3 + $0x1], 0  ;;  %s1729_s18 = smov 0   ;;  %s1731_s19 = smov 0  }
   0x2   :  { %s1733_s20 = smov 0   ;;  %s1735_s21 = smov 0  }
   0x3   :  { %s1737_s22 = smov 0   ;;  %s1739_s23 = smov 0  }
   0x4   :  { %s1741_s24 = smov 0   ;;  %s1743_s25 = smov 0  }
   0x5 LB: > { %2649 = sst [smem:[#allocation5_spill]] %s1656_s20  ;;  %s1389_s26 = sadd.s32 4294967295, %s1676_s25   ;;  %s1676_s25 = sphi %s1743_s25, %s18_s25   ;;  %s1672_s24 = sphi %s1741_s24, %s2713_s24   ;;  %s1668_s23 = sphi %s1739_s23, %s2712_s23   ;;  %s1664_s22 = sphi %s1737_s22, %s2711_s22   ;;  %s1660_s21 = sphi %s1735_s21, %s2710_s21   ;;  %s1656_s20 = sphi %s1733_s20, %s2709_s20   ;;  %s1652_s19 = sphi %s1731_s19, %s2715_s19   ;;  %s1648_s18 = sphi %s1729_s18, %s2714_s18  }
   0x6   : > { %2650 = sst [smem:[#allocation6_spill]] %s1668_s23  ;;  %s1390_s27 = sadd.s32 4294967294, %s1676_s25  }
   0x7   : > { %2651 = sst [smem:[#allocation7_spill]] %s1672_s24  ;;  %s27_s28 = sadd.s32 1, %s1668_s23 }
   0x8   : > { %p28_p0 = scmp.ge.s32.totalorder %s27_s28, 2  ;;  %s30_s29 = sadd.s32 1, %s1672_s24 }
   0x9   : > { %p172_p1 = scmp.ne.s32.totalorder %s1656_s20, %s1652_s19  ;;  %p173_p2 = scmp.eq.s32.totalorder %s1389_s26, 3 }
   0xa   : > { %s2717_s28 = smov (%p28_p0, %s27_s28), 0  ;;  %s2719_s29 = smov (!%p28_p0, %s30_s29), %s1672_s24 }
   0xb   : > { %2652 = sst [smem:[#allocation8_spill]] %s2717_s28  ;;  %p1778_p3 = por %p173_p2, %p172_p1 }
   0xc   : > { %p178_p4 = scmp.ne.s32.totalorder %s1652_s19, %s1648_s18  ;;  %p32_p5 = scmp.ge.s32.totalorder %s2719_s29, 2 }
   0xd   : > { %p179_p6 = scmp.eq.s32.totalorder %s1390_s27, 3  ;;  %p1393_p7 = scmp.ge.s32.totalorder %s1676_s25, 1 }
   0xe   : > { %p231_p8 = scmp.lt.s32.totalorder %s1676_s25, 5  ;;  %s2721_s29 = smov (%p32_p5, %s2719_s29), 0 }
   0xf   : > { %2654 = sst [smem:[#allocation9_spill]] %s2721_s29  ;;  %p1788_p9 = por %p179_p6, %p178_p4 }
  0x10   : > { %p232_p10 = pnand %p1393_p7, %p231_p8  ;;  %s159_s7 = ssub.s32 %s1672_s24, %s2721_s29 }
  0x11   : > { %s162_s8 = sadd.s32 1, %s1656_s20  ;;  %p160_p11 = scmp.eq.s32.totalorder %s159_s7, 0 }
  0x12   : > { %235 = sbr.rel (%p232_p10) target bundleno = 836 (0x344), region = 40 }
  0x13   : > { %s1796_s9 = scalar_select %p160_p11, %s1656_s20, %s162_s8  }
  0x15   : > { %2656 = sst [smem:[#allocation10_spill]] %s1796_s9 }
  0x17   : > { %s2622_s10 = sand.u32 1, %s1652_s19   ;;  %p273_p12 = scmp.lt.s32.totalorder %s1664_s22, 1 }
  0x18   : > { %s1394_s11 = sshll.u32 %s2622_s10, 4  ;;  %p278_p13 = scmp.lt.s32.totalorder %s1660_s21, 1 }
  0x19   : > { %s274_s12 = scalar_select %p273_p12, %s1664_s22, 1 }
  0x1a   : > { %s279_s13 = scalar_select %p278_p13, %s1660_s21, 1 }
  0x1b   : > { %s1416_s14 = sshll.u32 %s274_s12, 4  ;;  %s1823_s15 = scalar_lea.vmem [#allocation2], %s1394_s11 }
  0x1c   : > { %s277_s17 = scalar_lea.vmem %s2614_s1, %s1416_s14  ;;  %s1417_s26 = sshll.u32 %s279_s13, 4 }
  0x1d   : > { %s1811_s8 = scalar_lea.vmem %s2615_s2, %s1417_s26  ;;  %s1399_s29 = sshll.u32 %s279_s13, 2 }
  0x1e   : > { %s1816_s23 = scalar_lea.vmem %s2616_s3, %s1399_s29  ;;  %s1418_s10 = sshll.u32 %s279_s13, 5 }
  0x1f   : > { %s1821_s12 = scalar_lea.vmem %s2617_s4, %s1418_s10  ;;  %p1402_p0 = scmp.ne.s32.totalorder %s1660_s21, 0 }
  0x21   : > { %296 = sbr.rel (%p1402_p0) target bundleno = 40 (0x28), region = 44 }
  0x26   : > { %v297_v0 = vld [vmem:[%s277_s17] sm:$0xff]  ;;  %v298_v1 = vld [vmem:[%s277_s17 + $0x8] sm:$0xff] }
  0x27   : > { %299 = vst [vmem:[%s1823_s15] sm:$0xff] %v297_v0  ;;  %300 = vst [vmem:[%s1823_s15 + $0x8] sm:$0xff] %v298_v1 }
  0x28 PF: > { %vm354_vm0 = vcmask 1043456   ;;  %v1678_v6 = vmov 0   ;;  %v1831_v7 = vld [vmem:[%s1821_s12] sm:$0xff]  ;;  %v1836_v10 = vld [vmem:[%s1821_s12 + $0x10] sm:$0xff]  ;;  %vm347_vm1 = vcmask 64512   ;;  %v1839_v11 = vld [vmem:[%s1821_s12 + $0x8] sm:$0xff] }
  0x29   : > { %393 = vmatprep.mubr.bf16.mxu0 %v1678_v6  ;;  %1512 = vset.pattern.permute.xlu1 %v1678_v6  ;;  %v1543_v9 = vld [vmem:[%s1811_s8] sm:$0xff]   ;;  %v1844_v12 = vld [vmem:[%s1821_s12 + $0x18] sm:$0xff]  ;;  %v1544_v13 = vld [vmem:[%s1811_s8 + $0x8] sm:$0xff]   ;;  %v1679_v14 = vmov 5   ;;  %v1680_v15 = vmov 1   ;;  %v1681_v16 = vmov 2  }
  0x2a   : > { %1511 = vset.pattern.permute.xlu0 %v1678_v6  ;;  %1237 = vmatprep.mubr.bf16.mxu1 %v1678_v6  ;;  %v1682_v17 = vmov 3   ;;  %v1683_v18 = vmov 4   ;;  %v1684_v19 = vmov 6   ;;  %v1685_v20 = vmov 7   ;;  %s1689_s20 = smov 112   ;;  %s1690_s21 = smov 17  }
  0x2b   : > { %319 = vperm.xlu1 %1512, %v1831_v7   ;;  %329 = vperm.xlu0 %1511, %v1836_v10   ;;  %v1686_v21 = vmov 8   ;;  %v1687_v22 = vmov 9   ;;  %v1688_v23 = vmov 10   ;;  %s1691_s24 = smov 16   ;;  %s1692_s28 = smov 15   ;;  %vm1201_vm10 = vcmask 261120  }
  0x2c   : > { %s1693_s29 = smov 1   ;;  %s1694_s9 = smov 127  }
  0x2d   : > { %s1695_s10 = smov 113   ;;  %s1696_s11 = smov 111  }
  0x2e   : > { %v302_v2 = vld [vmem:[%s1823_s15 + $0x8] sm:$0xff]  ;;  %v301_v3 = vld [vmem:[%s1823_s15] sm:$0xff] }
  0x2f   : > { %v316_v4 = vpack.c.bf16 %v302_v2, %v302_v2  ;;  %v315_v5 = vpack.c.bf16 %v301_v3, %v301_v3  ;;  %324 = vperm.xlu1 %1512, %v1839_v11   ;;  %334 = vperm.xlu0 %1511, %v1844_v12  }
  0x31   : > { %1405 = vmatprep.subr.msk.bf16.mxu0 %vm354_vm0, %v316_v4  ;;  %v356_v8 = vsel %vm354_vm0, %v315_v5, 0 }
  0x32   : > { %376 = vmatpush1.bf16.msra.mxu0 %v356_v8 }
  0x33   : > { %1513 = vset.pattern.permute.xlu1 %v1679_v14  ;;  %1515 = vset.pattern.permute.xlu0 %v1680_v15 }
  0x34   : > { %499 = vperm.xlu1 %1513, %v1844_v12   ;;  %566 = vperm.xlu0 %1515, %v1844_v12  }
  0x35   : > { %1406 = vmatmul.mubr.msk.bf16.vlgmr.msra.gmra.mxu0 %vm347_vm1, %v1543_v9 }
  0x36   : > { %403 = vmatprep.mubr.bf16.mxu0 %v1678_v6 }
  0x38   : > { %1514 = vset.pattern.permute.xlu1 %v1680_v15  ;;  %1516 = vset.pattern.permute.xlu0 %v1679_v14 }
  0x39   : > { %562 = vperm.xlu1 %1514, %v1836_v10   ;;  %495 = vperm.xlu0 %1516, %v1836_v10  }
  0x3d   : > { %1407 = vmatmul.mubr.msk.bf16.gmra.mxu0 %vm347_vm1, %v1544_v13  ;;  %1517 = vset.pattern.permute.xlu1 %v1681_v16 }
  0x3e   : > { %639 = vperm.xlu1 %1517, %v1844_v12   ;;  %491 = vperm.xlu0 %1516, %v1839_v11  }
  0x42   : > { %1518 = vset.pattern.permute.xlu1 %v1679_v14  ;;  %1519 = vset.pattern.permute.xlu0 %v1681_v16 }
  0x43   : > { %487 = vperm.xlu1 %1518, %v1831_v7   ;;  %635 = vperm.xlu0 %1519, %v1836_v10  }
  0x47   : > { %1520 = vset.pattern.permute.xlu1 %v1680_v15  ;;  %631 = vperm.xlu0 %1519, %v1839_v11  }
  0x48   : > { %554 = vperm.xlu1 %1520, %v1831_v7  }
  0x4b   : > { %1523 = vset.pattern.permute.xlu0 %v1682_v17 }
  0x4c   : > { %558 = vperm.xlu1 %1520, %v1839_v11   ;;  %708 = vperm.xlu0 %1523, %v1836_v10  }
  0x50   : > { %1521 = vset.pattern.permute.xlu1 %v1682_v17  ;;  %704 = vperm.xlu0 %1523, %v1839_v11  }
  0x51   : > { %712 = vperm.xlu1 %1521, %v1844_v12  }
  0x54   : > { %1526 = vset.pattern.permute.xlu0 %v1683_v18 }
  0x55   : > { %1522 = vset.pattern.permute.xlu1 %v1681_v16  ;;  %781 = vperm.xlu0 %1526, %v1836_v10  }
  0x56   : > { %627 = vperm.xlu1 %1522, %v1831_v7  }
  0x59   : > { %777 = vperm.xlu0 %1526, %v1839_v11  }
  0x5a   : > { %1524 = vset.pattern.permute.xlu1 %v1683_v18 }
  0x5b   : > { %785 = vperm.xlu1 %1524, %v1844_v12  }
  0x5d   : > { %1529 = vset.pattern.permute.xlu0 %v1684_v19 }
  0x5e   : > { %854 = vperm.xlu0 %1529, %v1836_v10  }
  0x5f   : > { %1525 = vset.pattern.permute.xlu1 %v1682_v17 }
  0x60   : > { %700 = vperm.xlu1 %1525, %v1831_v7  }
  0x62   : > { %850 = vperm.xlu0 %1529, %v1839_v11  }
  0x64   : > { %1527 = vset.pattern.permute.xlu1 %v1684_v19 }
  0x65   : > { %858 = vperm.xlu1 %1527, %v1844_v12  }
  0x66   : > { %1532 = vset.pattern.permute.xlu0 %v1685_v20 }
  0x67   : > { %927 = vperm.xlu0 %1532, %v1836_v10  }
  0x69   : > { %1528 = vset.pattern.permute.xlu1 %v1683_v18 }
  0x6a   : > { %773 = vperm.xlu1 %1528, %v1831_v7  }
  0x6b   : > { %923 = vperm.xlu0 %1532, %v1839_v11  }
  0x6e   : > { %1530 = vset.pattern.permute.xlu1 %v1685_v20 }
  0x6f   : > { %931 = vperm.xlu1 %1530, %v1844_v12   ;;  %1535 = vset.pattern.permute.xlu0 %v1686_v21 }
  0x70   : > { %1000 = vperm.xlu0 %1535, %v1836_v10  }
  0x73   : > { %1531 = vset.pattern.permute.xlu1 %v1684_v19 }
  0x74   : > { %846 = vperm.xlu1 %1531, %v1831_v7   ;;  %996 = vperm.xlu0 %1535, %v1839_v11  }
  0x78   : > { %1533 = vset.pattern.permute.xlu1 %v1686_v21  ;;  %1538 = vset.pattern.permute.xlu0 %v1687_v22 }
  0x79   : > { %1004 = vperm.xlu1 %1533, %v1844_v12   ;;  %1073 = vperm.xlu0 %1538, %v1836_v10  }
  0x7d   : > { %1534 = vset.pattern.permute.xlu1 %v1685_v20  ;;  %1065 = vperm.xlu0 %1538, %v1831_v7  }
  0x7e   : > { %919 = vperm.xlu1 %1534, %v1831_v7  }
  0x81   : > { %1541 = vset.pattern.permute.xlu0 %v1688_v23 }
  0x82   : > { %1536 = vset.pattern.permute.xlu1 %v1687_v22  ;;  %1109 = vperm.xlu0 %1541, %v1844_v12  }
  0x83   : > { %1077 = vperm.xlu1 %1536, %v1844_v12  }
  0x87   : > { %1537 = vset.pattern.permute.xlu1 %v1686_v21 }
  0x88   : > { %992 = vperm.xlu1 %1537, %v1831_v7  }
  0x8c   : > { %1539 = vset.pattern.permute.xlu1 %v1687_v22 }
  0x8d   : > { %1069 = vperm.xlu1 %1539, %v1839_v11  }
  0x91   : > { %1540 = vset.pattern.permute.xlu1 %v1688_v23 }
  0x92   : > { %1105 = vperm.xlu1 %1540, %v1836_v10  }
  0xa6   : > { %v320_v24 = vpop.permute.xlu1 %319  ;;  %v330_v54 = vpop.permute.xlu0 %329 }
  0xaa   : > { %v325_v30 = vpop.permute.xlu1 %324  ;;  %v1902_v1 = vpop.permute.xlu0 %334 }
  0xaf   : > { %v1893_v59 = vpop.permute.xlu1 %499  ;;  %v1912_v6 = vpop.permute.xlu0 %566 }
  0xb0   : > { %2657 = vst [vmem:[#allocation11_spill] sm:$0xff] %v1893_v59  ;;  %2659 = vst [vmem:[#allocation13_spill] sm:$0xff] %v1912_v6 }
  0xb4   : > { %v1904_v3 = vpop.permute.xlu1 %562  ;;  %v1924_v15 = vpop.permute.xlu0 %495 }
  0xb5   : > { %2658 = vst [vmem:[#allocation12_spill] sm:$0xff] %v1904_v3  ;;  %2661 = vst [vmem:[#allocation15_spill] sm:$0xff] %v1924_v15 }
  0xb9   : > { %v1918_v10 = vpop.permute.xlu1 %639  ;;  %v1932_v19 = vpop.permute.xlu0 %491 }
  0xba   : > { %2660 = vst [vmem:[#allocation14_spill] sm:$0xff] %v1918_v10 }
  0xbe   : > { %v1926_v16 = vpop.permute.xlu1 %487 }
  0xc3   : > { %v1938_v20 = vpop.permute.xlu1 %554 }
  0xf5   : > { %v395_v25 = vpop.f32.mrf.mxu0 }
  0xf6   : > { %v396_v26 = vadd.f32 %v395_v25, %v320_v24 }
  0xf7   : > { %v397_v27 = vpop.f32.mrf.mxu0 }
  0xf8   : > { %v422_v28 = vmul.f32 0.044715, %v396_v26  ;;  %v398_v29 = vadd.f32 %v397_v27, %v320_v24  ;;  %v414_v52 = vmul.f32 0.5, %v396_v26  ;;  %v1944_v24 = vpop.permute.xlu0 %635 }
  0xf9   : > { %v399_v31 = vpop.f32.mrf.mxu0  ;;  %2662 = vst [vmem:[#allocation16_spill] sm:$0xff] %v1944_v24 }
  0xfa   : > { %v430_v32 = vmul.f32 %v422_v28, %v396_v26  ;;  %v423_v33 = vmul.f32 0.044715, %v398_v29  ;;  %v400_v34 = vadd.f32 %v399_v31, %v325_v30  ;;  %v415_v61 = vmul.f32 0.5, %v398_v29  ;;  %v1946_v28 = vpop.permute.xlu1 %558 }
  0xfb   : > { %v401_v46 = vpop.f32.mrf.mxu0 }
  0xfc   : > { %v438_v35 = vmul.f32 %v430_v32, %v396_v26  ;;  %v431_v36 = vmul.f32 %v423_v33, %v398_v29  ;;  %v424_v37 = vmul.f32 0.044715, %v400_v34  ;;  %v1886_v48 = vadd.f32 %v401_v46, %v325_v30 }
  0xfd   : > { %v416_v2 = vmul.f32 0.5, %v400_v34  ;;  %v405_v8 = vpop.f32.mrf.mxu0 }
  0xfe   : > { %v446_v38 = vadd.f32 %v438_v35, %v396_v26  ;;  %v439_v39 = vmul.f32 %v431_v36, %v398_v29  ;;  %v432_v40 = vmul.f32 %v424_v37, %v400_v34  ;;  %v425_v49 = vmul.f32 0.044715, %v1886_v48  ;;  %v1955_v33 = vpop.permute.xlu1 %712 }
  0xff   : > { %v406_v9 = vadd.f32 %v405_v8, %v330_v54  ;;  %v407_v12 = vpop.f32.mrf.mxu0  ;;  %2663 = vst [vmem:[#allocation17_spill] sm:$0xff] %v1955_v33 }
 0x100   : > { %v454_v41 = vmul.f32 0.7978846, %v446_v38  ;;  %v447_v42 = vadd.f32 %v439_v39, %v398_v29  ;;  %v440_v43 = vmul.f32 %v432_v40, %v400_v34  ;;  %v433_v50 = vmul.f32 %v425_v49, %v1886_v48 }
 0x101   : > { %v426_v13 = vmul.f32 0.044715, %v406_v9  ;;  %v408_v14 = vadd.f32 %v407_v12, %v330_v54  ;;  %v417_v29 = vmul.f32 0.5, %v1886_v48  ;;  %v409_v40 = vpop.f32.mrf.mxu0 }
 0x102   : > { %1545 = vtanh.f32 %v454_v41  ;;  %v455_v44 = vmul.f32 0.7978846, %v447_v42  ;;  %v448_v45 = vadd.f32 %v440_v43, %v400_v34  ;;  %v441_v58 = vmul.f32 %v433_v50, %v1886_v48  ;;  %v1957_v34 = vpop.permute.xlu0 %631  ;;  %v1967_v36 = vpop.permute.xlu1 %627 }
 0x103   : > { %v434_v17 = vmul.f32 %v426_v13, %v406_v9  ;;  %v427_v18 = vmul.f32 0.044715, %v408_v14  ;;  %v410_v41 = vadd.f32 %v409_v40, %v1902_v1  ;;  %v419_v50 = vmul.f32 0.5, %v408_v14 }
 0x104   : > { %1547 = vtanh.f32 %v455_v44  ;;  %v456_v47 = vmul.f32 0.7978846, %v448_v45  ;;  %v449_v0 = vadd.f32 %v441_v58, %v1886_v48  ;;  %v418_v45 = vmul.f32 0.5, %v406_v9 }
 0x105   : > { %v442_v21 = vmul.f32 %v434_v17, %v406_v9  ;;  %v435_v22 = vmul.f32 %v427_v18, %v408_v14 }
 0x106   : > { %1549 = vtanh.f32 %v456_v47  ;;  %v457_v5 = vmul.f32 0.7978846, %v449_v0  ;;  %v1969_v37 = vpop.permute.xlu0 %708  ;;  %v1975_v38 = vpop.permute.xlu1 %785  ;;  %v428_v47 = vmul.f32 0.044715, %v410_v41 }
 0x107   : > { %v450_v26 = vadd.f32 %v442_v21, %v406_v9  ;;  %v443_v27 = vmul.f32 %v435_v22, %v408_v14  ;;  %2664 = vst [vmem:[#allocation18_spill] sm:$0xff] %v1969_v37  ;;  %2665 = vst [vmem:[#allocation19_spill] sm:$0xff] %v1975_v38  ;;  %v411_v9 = vpop.f32.mrf.mxu0  ;;  %v420_v22 = vmul.f32 0.5, %v410_v41 }
 0x108   : > { %1551 = vtanh.f32 %v457_v5  ;;  %v412_v12 = vadd.f32 %v411_v9, %v1902_v1 }
 0x109   : > { %v458_v31 = vmul.f32 0.7978846, %v450_v26  ;;  %v451_v32 = vadd.f32 %v443_v27, %v408_v14 }
 0x10a   : > { %v1977_v39 = vpop.permute.xlu0 %704  ;;  %v1988_v43 = vpop.permute.xlu1 %700  ;;  %v429_v17 = vmul.f32 0.044715, %v412_v12 }
 0x10b   : > { %1553 = vtanh.f32 %v458_v31  ;;  %v459_v35 = vmul.f32 0.7978846, %v451_v32 }
 0x10d   : > { %1555 = vtanh.f32 %v459_v35 }
 0x10e   : > { %v1990_v44 = vpop.permute.xlu0 %781 }
 0x10f   : > { %v1546_v51 = vpop.eup %1545  ;;  %2666 = vst [vmem:[#allocation20_spill] sm:$0xff] %v1990_v44 }
 0x110   : > { %v470_v53 = vadd.f32 1.0, %v1546_v51 }
 0x111   : > { %v1548_v55 = vpop.eup %1547 }
 0x112   : > { %v1890_v56 = vmul.f32 %v470_v53, %v414_v52  ;;  %v471_v57 = vadd.f32 1.0, %v1548_v55  ;;  %v436_v52 = vmul.f32 %v428_v47, %v410_v41  ;;  %v1998_v53 = vpop.permute.xlu1 %858  ;;  %v2000_v54 = vpop.permute.xlu0 %777  ;;  %v526_v47 = vlaneseq }
 0x113   : > { %v1550_v60 = vpop.eup %1549  ;;  %2667 = vst [vmem:[#allocation21_spill] sm:$0xff] %v1998_v53 }
 0x114   : > { %950 = vrot.lane.b32.xlu0 %v1890_v56, %s1689_s20  ;;  %510 = vrot.lane.b32.xlu1 %v1890_v56, %s1690_s21  ;;  %v1899_v62 = vmul.f32 %v471_v57, %v415_v61  ;;  %v472_v63 = vadd.f32 1.0, %v1550_v60  ;;  %v444_v57 = vmul.f32 %v436_v52, %v410_v41  ;;  %v502_v38 = vmul.f32 %v1926_v16, %v1890_v56 }
 0x115   : > { %v1552_v23 = vpop.eup %1551 }
 0x116   : > { %v1910_v4 = vmul.f32 %v472_v63, %v416_v2  ;;  %v473_v25 = vadd.f32 1.0, %v1552_v23  ;;  %v2012_v58 = vpop.permute.xlu1 %773  ;;  %v2014_v60 = vpop.permute.xlu0 %854  ;;  %v452_v61 = vadd.f32 %v444_v57, %v410_v41  ;;  %v421_v57 = vmul.f32 0.5, %v412_v12 }
 0x117   : > { %2669 = vst [vmem:[#allocation23_spill] sm:$0xff] %v2014_v60  ;;  %v503_v33 = vmul.f32 %v1926_v16, %v1899_v62 }
 0x118   : > { %958 = vrot.lane.b32.xlu0 %v1899_v62, %s1689_s20  ;;  %585 = vrot.lane.b32.xlu1 %v1890_v56, %s1691_s24  ;;  %v1953_v30 = vmul.f32 %v473_v25, %v417_v29  ;;  %v1554_v42 = vpop.eup %1553  ;;  %v460_v63 = vmul.f32 0.7978846, %v452_v61  ;;  %v437_v25 = vmul.f32 %v429_v17, %v412_v12  ;;  %v504_v59 = vmul.f32 %v1932_v19, %v1910_v4 }
 0x119   : > { %v474_v46 = vadd.f32 1.0, %v1554_v42 }
 0x11a   : > { %v1556_v48 = vpop.eup %1555  ;;  %v2020_v0 = vpop.permute.xlu1 %931  ;;  %1557 = vtanh.f32 %v460_v63  ;;  %v445_v27 = vmul.f32 %v437_v25, %v412_v12 }
 0x11b   : > { %v1996_v49 = vmul.f32 %v474_v46, %v418_v45  ;;  %v475_v51 = vadd.f32 1.0, %v1556_v48  ;;  %2670 = vst [vmem:[#allocation24_spill] sm:$0xff] %v2020_v0  ;;  %v2022_v2 = vpop.permute.xlu0 %850  ;;  %v2094_v48 = vand.u32 127, %v526_v47 }
 0x11c   : > { %512 = vrot.lane.b32.xlu0 %v1910_v4, %s1690_s21  ;;  %658 = vrot.lane.b32.xlu1 %v1890_v56, %s1692_s28  ;;  %v453_v32 = vadd.f32 %v445_v27, %v412_v12 }
 0x11d   : > { %v2006_v55 = vmul.f32 %v475_v51, %v419_v50  ;;  %vm966_vm2 = vcmp.lt.s32.totalorder %v2094_v48, 112  ;;  %vm528_vm3 = vcmp.lt.s32.totalorder %v2094_v48, 17  ;;  %vm601_vm4 = vcmp.lt.s32.totalorder %v2094_v48, 16 }
 0x11e   : > { %v2034_v8 = vpop.permute.xlu1 %846  ;;  %v461_v41 = vmul.f32 0.7978846, %v453_v32  ;;  %vm674_vm5 = vcmp.lt.s32.totalorder %v2094_v48, 15  ;;  %vm747_vm6 = vcmp.lt.s32.totalorder %v2094_v48, 1  ;;  %vm820_vm7 = vcmp.lt.s32.totalorder %v2094_v48, 127 }
 0x11f   : > { %2668 = vst [vmem:[#allocation22_spill] sm:$0xff] %v2006_v55  ;;  %v2032_v5 = vpop.permute.xlu0 %927  ;;  %vm893_vm8 = vcmp.lt.s32.totalorder %v2094_v48, 113  ;;  %vm1039_vm9 = vcmp.lt.s32.totalorder %v2094_v48, 111 }
 0x120   : > { %587 = vrot.lane.b32.xlu0 %v1910_v4, %s1691_s24  ;;  %731 = vrot.lane.b32.xlu1 %v1890_v56, %s1693_s29  ;;  %2671 = vst [vmem:[#allocation25_spill] sm:$0xff] %v2032_v5  ;;  %1559 = vtanh.f32 %v461_v41 }
 0x122   : > { %v2043_v14 = vpop.permute.xlu1 %1004 }
 0x123   : > { %v2041_v13 = vpop.permute.xlu0 %923  ;;  %2672 = vst [vmem:[#allocation26_spill] sm:$0xff] %v2043_v14 }
 0x124   : > { %660 = vrot.lane.b32.xlu0 %v1910_v4, %s1692_s28  ;;  %804 = vrot.lane.b32.xlu1 %v1890_v56, %s1694_s9 }
 0x126   : > { %v2055_v1 = vpop.permute.xlu1 %919 }
 0x127   : > { %v1558_v18 = vpop.eup %1557  ;;  %v2053_v21 = vpop.permute.xlu0 %1000 }
 0x128   : > { %733 = vrot.lane.b32.xlu0 %v1910_v4, %s1693_s29  ;;  %877 = vrot.lane.b32.xlu1 %v1890_v56, %s1695_s10  ;;  %2673 = vst [vmem:[#allocation27_spill] sm:$0xff] %v2053_v21  ;;  %v476_v23 = vadd.f32 1.0, %v1558_v18 }
 0x12a   : > { %v2061_v26 = vmul.f32 %v476_v23, %v420_v22  ;;  %v2065_v31 = vpop.permute.xlu1 %1077 }
 0x12b   : > { %v2063_v29 = vpop.permute.xlu0 %996  ;;  %2675 = vst [vmem:[#allocation29_spill] sm:$0xff] %v2065_v31 }
 0x12c   : > { %806 = vrot.lane.b32.xlu0 %v1910_v4, %s1694_s9  ;;  %1023 = vrot.lane.b32.xlu1 %v1890_v56, %s1696_s11  ;;  %2674 = vst [vmem:[#allocation28_spill] sm:$0xff] %v2061_v26 }
 0x12d   : > { %v1560_v52 = vpop.eup %1559 }
 0x12e   : > { %v2076_v40 = vpop.permute.xlu1 %992  ;;  %v477_v61 = vadd.f32 1.0, %v1560_v52 }
 0x12f   : > { %v2074_v35 = vpop.permute.xlu0 %1073 }
 0x130   : > { %879 = vrot.lane.b32.xlu0 %v1910_v4, %s1695_s10  ;;  %518 = vrot.lane.b32.xlu1 %v1899_v62, %s1690_s21  ;;  %2676 = vst [vmem:[#allocation30_spill] sm:$0xff] %v2074_v35  ;;  %v2111_v22 = vmul.f32 %v477_v61, %v421_v57 }
 0x132   : > { %v2082_v45 = vpop.permute.xlu1 %1069 }
 0x133   : > { %v2080_v42 = vpop.permute.xlu0 %1065  ;;  %2678 = vst [vmem:[#allocation32_spill] sm:$0xff] %v2082_v45  ;;  %v303_v45 = vld [vmem:[%s2613_s0] sm:$0xff] }
 0x134   : > { %520 = vrot.lane.b32.xlu0 %v1953_v30, %s1690_s21  ;;  %593 = vrot.lane.b32.xlu1 %v1899_v62, %s1691_s24  ;;  %2677 = vst [vmem:[#allocation31_spill] sm:$0xff] %v2080_v42 }
 0x136   : > { %v2090_v46 = vpop.permute.xlu1 %1105 }
 0x137   : > { %2680 = vst [vmem:[#allocation34_spill] sm:$0xff] %v2090_v46 }
 0x138   : > { %595 = vrot.lane.b32.xlu0 %v1953_v30, %s1691_s24  ;;  %666 = vrot.lane.b32.xlu1 %v1899_v62, %s1692_s28 }
 0x13c   : > { %668 = vrot.lane.b32.xlu0 %v1953_v30, %s1692_s28  ;;  %739 = vrot.lane.b32.xlu1 %v1899_v62, %s1693_s29 }
 0x140   : > { %741 = vrot.lane.b32.xlu0 %v1953_v30, %s1693_s29  ;;  %812 = vrot.lane.b32.xlu1 %v1899_v62, %s1694_s9 }
 0x144   : > { %814 = vrot.lane.b32.xlu0 %v1953_v30, %s1694_s9  ;;  %885 = vrot.lane.b32.xlu1 %v1899_v62, %s1695_s10 }
 0x148   : > { %887 = vrot.lane.b32.xlu0 %v1953_v30, %s1695_s10  ;;  %952 = vrot.lane.b32.xlu1 %v1910_v4, %s1689_s20 }
 0x14c   : > { %589 = vrot.lane.b32.xlu0 %v1996_v49, %s1691_s24  ;;  %1025 = vrot.lane.b32.xlu1 %v1910_v4, %s1696_s11 }
 0x150   : > { %522 = vrot.lane.b32.xlu0 %v2006_v55, %s1690_s21  ;;  %960 = vrot.lane.b32.xlu1 %v1953_v30, %s1689_s20 }
 0x154   : > { %597 = vrot.lane.b32.xlu0 %v2006_v55, %s1691_s24  ;;  %514 = vrot.lane.b32.xlu1 %v1996_v49, %s1690_s21 }
 0x158   : > { %670 = vrot.lane.b32.xlu0 %v2006_v55, %s1692_s28  ;;  %662 = vrot.lane.b32.xlu1 %v1996_v49, %s1692_s28 }
 0x15c   : > { %743 = vrot.lane.b32.xlu0 %v2006_v55, %s1693_s29  ;;  %735 = vrot.lane.b32.xlu1 %v1996_v49, %s1693_s29 }
 0x160   : > { %816 = vrot.lane.b32.xlu0 %v2006_v55, %s1694_s9  ;;  %808 = vrot.lane.b32.xlu1 %v1996_v49, %s1694_s9 }
 0x164   : > { %889 = vrot.lane.b32.xlu0 %v2006_v55, %s1695_s10  ;;  %881 = vrot.lane.b32.xlu1 %v1996_v49, %s1695_s10 }
 0x168   : > { %962 = vrot.lane.b32.xlu0 %v2006_v55, %s1689_s20  ;;  %954 = vrot.lane.b32.xlu1 %v1996_v49, %s1689_s20 }
 0x16c   : > { %1035 = vrot.lane.b32.xlu0 %v2006_v55, %s1696_s11  ;;  %1027 = vrot.lane.b32.xlu1 %v1996_v49, %s1696_s11 }
 0x170   : > { %1031 = vrot.lane.b32.xlu0 %v1899_v62, %s1696_s11  ;;  %516 = vrot.lane.b32.xlu1 %v2061_v26, %s1690_s21 }
 0x174   : > { %1097 = vperm.xlu0 %1541, %v1831_v7   ;;  %591 = vrot.lane.b32.xlu1 %v2061_v26, %s1691_s24  ;;  %v2088_v7 = vpop.permute.xlu0 %1109 }
 0x175   : > { %2679 = vst [vmem:[#allocation33_spill] sm:$0xff] %v2088_v7 }
 0x178   : > { %664 = vrot.lane.b32.xlu1 %v2061_v26, %s1692_s28 }
 0x17c   : > { %737 = vrot.lane.b32.xlu1 %v2061_v26, %s1693_s29 }
 0x180   : > { %810 = vrot.lane.b32.xlu1 %v2061_v26, %s1694_s9 }
 0x184   : > { %883 = vrot.lane.b32.xlu1 %v2061_v26, %s1695_s10 }
 0x186   : > { %v951_v50 = vpop.permute.xlu0 %950  ;;  %v511_v51 = vpop.permute.xlu1 %510 }
 0x188   : > { %956 = vrot.lane.b32.xlu1 %v2061_v26, %s1689_s20 }
 0x18a   : > { %v959_v63 = vpop.permute.xlu0 %958  ;;  %v2099_v9 = vpop.permute.xlu1 %585 }
 0x18b   : > { %v2103_v17 = vsel %vm966_vm2, %v951_v50, %v959_v63  ;;  %v2107_v18 = vsel %vm966_vm2, %v959_v63, %v951_v50  ;;  %v2127_v50 = vshrl.u32 %v526_v47, 7  ;;  %v304_v47 = vld [vmem:[%s2613_s0 + $0x8] sm:$0xff] }
 0x18c   : > { %1029 = vrot.lane.b32.xlu1 %v2061_v26, %s1696_s11  ;;  %v505_v26 = vmul.f32 %v1932_v19, %v1953_v30 }
 0x18d   : > { %v977_v61 = vsub.s32 7, %v2127_v50  ;;  %v539_v63 = vsub.s32 0, %v2127_v50  ;;  %v612_v14 = vsub.s32 1, %v2127_v50  ;;  %v685_v10 = vsub.s32 2, %v2127_v50 }
 0x18e   : > { %v513_v23 = vpop.permute.xlu0 %512  ;;  %v2113_v25 = vpop.permute.xlu1 %658  ;;  %v758_v56 = vsub.s32 3, %v2127_v50  ;;  %v831_v35 = vsub.s32 5, %v2127_v50 }
 0x18f   : > { %v2150_v0 = vrot.slane %v303_v45, %v977_v61  ;;  %v2155_v53 = vrot.slane %v303_v45, %v539_v63  ;;  %v2157_v42 = vrot.slane %v304_v47, %v539_v63  ;;  %v2163_v46 = vrot.slane %v304_v47, %v977_v61 }
 0x190   : > { %524 = vrot.lane.b32.xlu1 %v2111_v22, %s1690_s21  ;;  %v2178_v61 = vrot.slane %v303_v45, %v612_v14  ;;  %v2180_v6 = vrot.slane %v304_v47, %v612_v14  ;;  %v2188_v21 = vrot.slane %v303_v45, %v685_v10  ;;  %v2190_v5 = vrot.slane %v304_v47, %v685_v10 }
 0x191   : > { %v904_v14 = vsub.s32 6, %v2127_v50  ;;  %v2196_v60 = vrot.slane %v303_v45, %v758_v56  ;;  %v2198_v44 = vrot.slane %v304_v47, %v758_v56  ;;  %v2214_v24 = vrot.slane %v303_v45, %v831_v35 }
 0x192   : > { %v2117_v12 = vpop.permute.xlu0 %587  ;;  %v2119_v27 = vpop.permute.xlu1 %731  ;;  %v2219_v3 = vrot.slane %v304_v47, %v831_v35 }
 0x193   : > { %v2221_v55 = vrot.slane %v303_v45, %v904_v14 }
 0x194   : > { %599 = vrot.lane.b32.xlu1 %v2111_v22, %s1691_s24 }
 0x196   : > { %v2123_v32 = vpop.permute.xlu0 %660  ;;  %v2125_v41 = vpop.permute.xlu1 %804 }
 0x198   : > { %672 = vrot.lane.b32.xlu1 %v2111_v22, %s1692_s28  ;;  %s2707_s28 = sand.u32 1, %s1652_s19  }
 0x19a   : > { %v2131_v52 = vpop.permute.xlu0 %733  ;;  %v2133_v57 = vpop.permute.xlu1 %877 }
 0x19c   : > { %745 = vrot.lane.b32.xlu1 %v2111_v22, %s1693_s29  ;;  %s1269_s29 = scalar_lea.sflag [#allocation3], %s2707_s28 }
 0x19e   : > { %v2145_v7 = vpop.permute.xlu0 %806  ;;  %v2147_v31 = vpop.permute.xlu1 %1023 }
 0x19f   : > { %2681 = vst [vmem:[#allocation35_spill] sm:$0xff] %v2147_v31 }
 0x1a0   : > { %818 = vrot.lane.b32.xlu1 %v2111_v22, %s1694_s9 }
 0x1a2   : > { %v2170_v31 = vpop.permute.xlu0 %879  ;;  %v519_v63 = vpop.permute.xlu1 %518 }
 0x1a3   : > { %v529_v62 = vsel %vm528_vm3, %v511_v51, %v519_v63  ;;  %v533_v16 = vsel %vm528_vm3, %v519_v63, %v511_v51 }
 0x1a4   : > { %v545_v4 = vmul.f32 %v2155_v53, %v533_v16  ;;  %v546_v19 = vmul.f32 %v2157_v42, %v529_v62  ;;  %891 = vrot.lane.b32.xlu1 %v2111_v22, %s1695_s10 }
 0x1a6   : > { %v569_v51 = vmul.f32 %v1938_v20, %v545_v4  ;;  %v570_v63 = vmul.f32 %v1938_v20, %v546_v19  ;;  %v521_v62 = vpop.permute.xlu0 %520  ;;  %v594_v16 = vpop.permute.xlu1 %593 }
 0x1a7   : > { %v530_v37 = vsel %vm528_vm3, %v513_v23, %v521_v62  ;;  %v534_v10 = vsel %vm528_vm3, %v521_v62, %v513_v23  ;;  %v602_v50 = vsel %vm601_vm4, %v2099_v9, %v594_v16  ;;  %v606_v20 = vsel %vm601_vm4, %v594_v16, %v2099_v9 }
 0x1a8   : > { %v577_v4 = vadd.f32 %v569_v51, %v502_v38  ;;  %v547_v19 = vmul.f32 %v2155_v53, %v534_v10  ;;  %v548_v56 = vmul.f32 %v2157_v42, %v530_v37  ;;  %964 = vrot.lane.b32.xlu1 %v2111_v22, %s1689_s20  ;;  %v618_v23 = vmul.f32 %v2178_v61, %v606_v20 }
 0x1a9   : > { %v619_v62 = vmul.f32 %v2180_v6, %v602_v50  ;;  %v578_v38 = vadd.f32 %v570_v63, %v503_v33  ;;  %v2225_v10 = vrot.slane %v304_v47, %v904_v14 }
 0x1aa   : > { %v571_v9 = vmul.f32 %v1946_v28, %v547_v19  ;;  %v572_v37 = vmul.f32 %v1946_v28, %v548_v56  ;;  %v596_v51 = vpop.permute.xlu0 %595  ;;  %v667_v16 = vpop.permute.xlu1 %666  ;;  %v642_v15 = vmul.f32 %v1967_v36, %v618_v23 }
 0x1ab   : > { %v643_v20 = vmul.f32 %v1967_v36, %v619_v62  ;;  %v603_v35 = vsel %vm601_vm4, %v2117_v12, %v596_v51  ;;  %v607_v33 = vsel %vm601_vm4, %v596_v51, %v2117_v12  ;;  %v675_v14 = vsel %vm674_vm5, %v2113_v25, %v667_v16 }
 0x1ac   : > { %v579_v45 = vadd.f32 %v571_v9, %v504_v59  ;;  %v580_v63 = vadd.f32 %v572_v37, %v505_v26  ;;  %v620_v28 = vmul.f32 %v2178_v61, %v607_v33  ;;  %v621_v50 = vmul.f32 %v2180_v6, %v603_v35  ;;  %1037 = vrot.lane.b32.xlu1 %v2111_v22, %s1696_s11 }
 0x1ad   : > { %v650_v36 = vadd.f32 %v642_v15, %v577_v4  ;;  %v651_v47 = vadd.f32 %v643_v20, %v578_v38  ;;  %v679_v59 = vsel %vm674_vm5, %v667_v16, %v2113_v25  ;;  %v692_v56 = vmul.f32 %v2190_v5, %v675_v14 }
 0x1ae   : > { %v644_v26 = vmul.f32 %v1957_v34, %v620_v28  ;;  %v645_v12 = vmul.f32 %v1957_v34, %v621_v50  ;;  %v691_v19 = vmul.f32 %v2188_v21, %v679_v59  ;;  %v669_v23 = vpop.permute.xlu0 %668  ;;  %v740_v62 = vpop.permute.xlu1 %739  ;;  %v984_v33 = vmul.f32 %v2163_v46, %v2107_v18 }
 0x1af   : > { %v676_v15 = vsel %vm674_vm5, %v2123_v32, %v669_v23  ;;  %v680_v4 = vsel %vm674_vm5, %v669_v23, %v2123_v32  ;;  %v748_v25 = vsel %vm747_vm6, %v2119_v27, %v740_v62  ;;  %v752_v34 = vsel %vm747_vm6, %v740_v62, %v2119_v27 }
 0x1b0   : > { %v652_v38 = vadd.f32 %v644_v26, %v579_v45  ;;  %v653_v9 = vadd.f32 %v645_v12, %v580_v63  ;;  %v715_v37 = vmul.f32 %v1988_v43, %v691_v19  ;;  %v716_v51 = vmul.f32 %v1988_v43, %v692_v56  ;;  %1033 = vrot.lane.b32.xlu1 %v1953_v30, %s1696_s11 }
 0x1b1   : > { %v693_v16 = vmul.f32 %v2188_v21, %v680_v4  ;;  %v694_v32 = vmul.f32 %v2190_v5, %v676_v15  ;;  %v764_v20 = vmul.f32 %v2196_v60, %v752_v34  ;;  %v765_v35 = vmul.f32 %v2198_v44, %v748_v25 }
 0x1b2   : > { %v983_v27 = vmul.f32 %v2150_v0, %v2103_v17  ;;  %v723_v45 = vadd.f32 %v715_v37, %v650_v36  ;;  %v724_v63 = vadd.f32 %v716_v51, %v651_v47  ;;  %v742_v43 = vpop.permute.xlu0 %741  ;;  %v813_v28 = vpop.permute.xlu1 %812 }
 0x1b3   : > { %v717_v30 = vmul.f32 %v1977_v39, %v693_v16  ;;  %v718_v50 = vmul.f32 %v1977_v39, %v694_v32  ;;  %v788_v14 = vmul.f32 %v2012_v58, %v764_v20  ;;  %v789_v59 = vmul.f32 %v2012_v58, %v765_v35 }
 0x1b4   : > { %v749_v26 = vsel %vm747_vm6, %v2131_v52, %v742_v43  ;;  %v753_v17 = vsel %vm747_vm6, %v742_v43, %v2131_v52  ;;  %v821_v18 = vsel %vm820_vm7, %v2125_v41, %v813_v28  ;;  %v825_v39 = vsel %vm820_vm7, %v813_v28, %v2125_v41  ;;  %1101 = vperm.xlu1 %1540, %v1839_v11  }
 0x1b5   : > { %v725_v36 = vadd.f32 %v717_v30, %v652_v38  ;;  %v726_v58 = vadd.f32 %v718_v50, %v653_v9  ;;  %v796_v47 = vadd.f32 %v788_v14, %v723_v45  ;;  %v797_v12 = vadd.f32 %v789_v59, %v724_v63 }
 0x1b6   : > { %v766_v19 = vmul.f32 %v2196_v60, %v753_v17  ;;  %v767_v56 = vmul.f32 %v2198_v44, %v749_v26  ;;  %v837_v52 = vmul.f32 %v2214_v24, %v821_v18  ;;  %v838_v23 = vmul.f32 %v2219_v3, %v825_v39  ;;  %v815_v62 = vpop.permute.xlu0 %814  ;;  %v886_v15 = vpop.permute.xlu1 %885 }
 0x1b7   : > { %v822_v41 = vsel %vm820_vm7, %v2145_v7, %v815_v62  ;;  %v826_v11 = vsel %vm820_vm7, %v815_v62, %v2145_v7  ;;  %v894_v4 = vsel %vm893_vm8, %v2133_v57, %v886_v15  ;;  %v898_v25 = vsel %vm893_vm8, %v886_v15, %v2133_v57 }
 0x1b8   : > { %v790_v34 = vmul.f32 %v2000_v54, %v766_v19  ;;  %v791_v38 = vmul.f32 %v2000_v54, %v767_v56  ;;  %v861_v9 = vmul.f32 %v2034_v8, %v837_v52  ;;  %v862_v37 = vmul.f32 %v2034_v8, %v838_v23 }
 0x1b9   : > { %v839_v51 = vmul.f32 %v2214_v24, %v822_v41  ;;  %v840_v7 = vmul.f32 %v2219_v3, %v826_v11  ;;  %v910_v16 = vmul.f32 %v2221_v55, %v894_v4  ;;  %v911_v32 = vmul.f32 %v2225_v10, %v898_v25 }
 0x1ba   : > { %v798_v20 = vadd.f32 %v790_v34, %v725_v36  ;;  %v799_v35 = vadd.f32 %v791_v38, %v726_v58  ;;  %v869_v45 = vadd.f32 %v861_v9, %v796_v47  ;;  %v870_v57 = vadd.f32 %v862_v37, %v797_v12  ;;  %v888_v63 = vpop.permute.xlu0 %887  ;;  %v953_v43 = vpop.permute.xlu1 %952 }
 0x1bb   : > { %v863_v54 = vmul.f32 %v2022_v2, %v839_v51  ;;  %v864_v28 = vmul.f32 %v2022_v2, %v840_v7  ;;  %v934_v8 = vmul.f32 %v2055_v1, %v910_v16  ;;  %v935_v30 = vmul.f32 %v2055_v1, %v911_v32 }
 0x1bc   : > { %v1007_v50 = vmul.f32 %v2076_v40, %v983_v27  ;;  %v1008_v14 = vmul.f32 %v2076_v40, %v984_v33  ;;  %v895_v59 = vsel %vm893_vm8, %v2170_v31, %v888_v63  ;;  %v899_v26 = vsel %vm893_vm8, %v888_v63, %v2170_v31 }
 0x1bd   : > { %v871_v17 = vadd.f32 %v863_v54, %v798_v20  ;;  %v872_v18 = vadd.f32 %v864_v28, %v799_v35  ;;  %v942_v39 = vadd.f32 %v934_v8, %v869_v45  ;;  %v943_v2 = vadd.f32 %v935_v30, %v870_v57  ;;  %v2682_v35 = vld [vmem:[#allocation15_spill] sm:$0xff]  ;;  %v2683_v57 = vld [vmem:[#allocation22_spill] sm:$0xff] }
 0x1be   : > { %v912_v36 = vmul.f32 %v2221_v55, %v895_v59  ;;  %v913_v1 = vmul.f32 %v2225_v10, %v899_v26  ;;  %v590_v58 = vpop.permute.xlu0 %589  ;;  %v2329_v27 = vpop.permute.xlu1 %1025  ;;  %v506_v45 = vmul.f32 %v2682_v35, %v1996_v49  ;;  %v507_v63 = vmul.f32 %v2682_v35, %v2683_v57 }
 0x1bf   : > { %v2331_v40 = vadd.f32 %v1007_v50, %v942_v39  ;;  %v2333_v33 = vadd.f32 %v1008_v14, %v943_v2  ;;  %v2685_v50 = vld [vmem:[#allocation16_spill] sm:$0xff] }
 0x1c0   : > { %v936_v47 = vmul.f32 %v2041_v13, %v912_v36  ;;  %v937_v12 = vmul.f32 %v2041_v13, %v913_v1 }
 0x1c2   : > { %v523_v31 = vpop.permute.xlu0 %522  ;;  %v961_v19 = vpop.permute.xlu1 %960  ;;  %v944_v56 = vadd.f32 %v936_v47, %v871_v17  ;;  %v945_v52 = vadd.f32 %v937_v12, %v872_v18 }
 0x1c3   : > { %v968_v23 = vsel %vm966_vm2, %v953_v43, %v961_v19  ;;  %v972_v62 = vsel %vm966_vm2, %v961_v19, %v953_v43  ;;  %v2684_v43 = vld [vmem:[#allocation12_spill] sm:$0xff] }
 0x1c4   : > { %v985_v15 = vmul.f32 %v2150_v0, %v968_v23  ;;  %v986_v41 = vmul.f32 %v2163_v46, %v972_v62 }
 0x1c6   : > { %v1009_v11 = vmul.f32 %v2063_v29, %v985_v15  ;;  %v1010_v4 = vmul.f32 %v2063_v29, %v986_v41  ;;  %v598_v25 = vpop.permute.xlu0 %597  ;;  %v515_v13 = vpop.permute.xlu1 %514 }
 0x1c7   : > { %v604_v34 = vsel %vm601_vm4, %v590_v58, %v598_v25  ;;  %v608_v38 = vsel %vm601_vm4, %v598_v25, %v590_v58  ;;  %v531_v9 = vsel %vm528_vm3, %v515_v13, %v523_v31  ;;  %v535_v37 = vsel %vm528_vm3, %v523_v31, %v515_v13  ;;  %v2686_v58 = vld [vmem:[#allocation18_spill] sm:$0xff] }
 0x1c8   : > { %v622_v51 = vmul.f32 %v2178_v61, %v608_v38  ;;  %v623_v7 = vmul.f32 %v2180_v6, %v604_v34  ;;  %v549_v29 = vmul.f32 %v2155_v53, %v535_v37  ;;  %v550_v16 = vmul.f32 %v2157_v42, %v531_v9 }
 0x1c9   : > { %v2357_v32 = vadd.f32 %v1009_v11, %v944_v56  ;;  %v2359_v20 = vadd.f32 %v1010_v4, %v945_v52  ;;  %v2687_v11 = vld [vmem:[#allocation20_spill] sm:$0xff] }
 0x1ca   : > { %v573_v54 = vmul.f32 %v2684_v43, %v549_v29  ;;  %v574_v28 = vmul.f32 %v2684_v43, %v550_v16  ;;  %v671_v8 = vpop.permute.xlu0 %670  ;;  %v663_v30 = vpop.permute.xlu1 %662  ;;  %v646_v14 = vmul.f32 %v2685_v50, %v622_v51  ;;  %v647_v59 = vmul.f32 %v2685_v50, %v623_v7  ;;  %v2688_v16 = vld [vmem:[#allocation23_spill] sm:$0xff] }
 0x1cb   : > { %v677_v26 = vsel %vm674_vm5, %v663_v30, %v671_v8  ;;  %v681_v17 = vsel %vm674_vm5, %v671_v8, %v663_v30  ;;  %v1697_v43 = vmov 11   ;;  %v1581_v8 = vld [vmem:[%s1821_s12] sm:$0xff]  ;;  %s1283_s12 = sshll.u32 %s1823_s15, 4  ;;  %s1284_s12 = int_to_ptr.vmem [resolvable:$true] %s1283_s12 }
 0x1cc   : > { %v581_v49 = vadd.f32 %v573_v54, %v506_v45  ;;  %v582_v18 = vadd.f32 %v574_v28, %v507_v63  ;;  %v695_v39 = vmul.f32 %v2188_v21, %v681_v17  ;;  %v696_v2 = vmul.f32 %v2190_v5, %v677_v26  ;;  %1542 = vset.pattern.permute.xlu0 %v1697_v43  ;;  %v2689_v26 = vld [vmem:[#allocation25_spill] sm:$0xff]  ;;  %s1584_s9 = scalar_lea.vmem %s1284_s12, 256 }
 0x1cd   : > { %1198 = vperm.xlu0 %1542, %v1581_v8   ;;  %p1585_p1 = scmp.ne.s32.totalorder %s1284_s12, %s1584_s9 }
 0x1ce   : > { %v654_v36 = vadd.f32 %v646_v14, %v581_v49  ;;  %v655_v1 = vadd.f32 %v647_v59, %v582_v18  ;;  %v719_v47 = vmul.f32 %v2686_v58, %v695_v39  ;;  %v720_v12 = vmul.f32 %v2686_v58, %v696_v2  ;;  %v744_v31 = vpop.permute.xlu0 %743  ;;  %v736_v19 = vpop.permute.xlu1 %735 }
 0x1cf   : > { %v750_v56 = vsel %vm747_vm6, %v736_v19, %v744_v31  ;;  %v754_v52 = vsel %vm747_vm6, %v744_v31, %v736_v19  ;;  %v2412_v31 = vld [vmem:[%s2613_s0 + $0x10] ss:$0 sm:$0xff]  ;;  %v2417_v19 = vld [vmem:[%s2613_s0 + $0x18] ss:$0 sm:$0xff]  ;;  %p1586_p2 = pnand %p1585_p1, %p1778_p3 }
 0x1d0   : > { %v727_v23 = vadd.f32 %v719_v47, %v654_v36  ;;  %v728_v62 = vadd.f32 %v720_v12, %v655_v1  ;;  %v768_v15 = vmul.f32 %v2196_v60, %v754_v52  ;;  %v769_v41 = vmul.f32 %v2198_v44, %v750_v56  ;;  %v2690_v56 = vld [vmem:[#allocation27_spill] sm:$0xff] }
 0x1d1   : > { %p1587_p4 = pneg %p1586_p2 }
 0x1d2   : > { %v792_v4 = vmul.f32 %v2687_v11, %v768_v15  ;;  %v793_v25 = vmul.f32 %v2687_v11, %v769_v41  ;;  %v817_v13 = vpop.permute.xlu0 %816  ;;  %v809_v34 = vpop.permute.xlu1 %808 }
 0x1d3   : > { %v823_v38 = vsel %vm820_vm7, %v809_v34, %v817_v13  ;;  %v827_v9 = vsel %vm820_vm7, %v817_v13, %v809_v34 }
 0x1d4   : > { %v800_v37 = vadd.f32 %v792_v4, %v727_v23  ;;  %v801_v51 = vadd.f32 %v793_v25, %v728_v62  ;;  %v841_v7 = vmul.f32 %v2214_v24, %v823_v38  ;;  %v842_v29 = vmul.f32 %v2219_v3, %v827_v9  ;;  %v2691_v38 = vld [vmem:[#allocation30_spill] sm:$0xff] }
 0x1d6   : > { %v865_v35 = vmul.f32 %v2688_v16, %v841_v7  ;;  %v866_v45 = vmul.f32 %v2688_v16, %v842_v29  ;;  %v890_v57 = vpop.permute.xlu0 %889  ;;  %v882_v63 = vpop.permute.xlu1 %881 }
 0x1d7   : > { %v896_v54 = vsel %vm893_vm8, %v882_v63, %v890_v57  ;;  %v900_v28 = vsel %vm893_vm8, %v890_v57, %v882_v63 }
 0x1d8   : > { %v873_v30 = vadd.f32 %v865_v35, %v800_v37  ;;  %v874_v50 = vadd.f32 %v866_v45, %v801_v51  ;;  %v914_v14 = vmul.f32 %v2221_v55, %v896_v54  ;;  %v915_v59 = vmul.f32 %v2225_v10, %v900_v28 }
 0x1da   : > { %v938_v17 = vmul.f32 %v2689_v26, %v914_v14  ;;  %v939_v49 = vmul.f32 %v2689_v26, %v915_v59  ;;  %v963_v18 = vpop.permute.xlu0 %962  ;;  %v955_v39 = vpop.permute.xlu1 %954 }
 0x1db   : > { %v969_v2 = vsel %vm966_vm2, %v955_v39, %v963_v18  ;;  %v973_v36 = vsel %vm966_vm2, %v963_v18, %v955_v39 }
 0x1dc   : > { %v946_v1 = vadd.f32 %v938_v17, %v873_v30  ;;  %v947_v58 = vadd.f32 %v939_v49, %v874_v50  ;;  %v987_v47 = vmul.f32 %v2150_v0, %v969_v2  ;;  %v988_v12 = vmul.f32 %v2163_v46, %v973_v36 }
 0x1de   : > { %v1011_v52 = vmul.f32 %v2690_v56, %v987_v47  ;;  %v1012_v23 = vmul.f32 %v2690_v56, %v988_v12  ;;  %v1036_v62 = vpop.permute.xlu0 %1035  ;;  %v1028_v15 = vpop.permute.xlu1 %1027  ;;  %v2692_v47 = vld [vmem:[#allocation13_spill] sm:$0xff] }
 0x1df   : > { %v1042_v41 = vsel %vm1039_vm9, %v1028_v15, %v1036_v62  ;;  %v1046_v11 = vsel %vm1039_vm9, %v1036_v62, %v1028_v15  ;;  %v2694_v15 = vld [vmem:[#allocation28_spill] sm:$0xff] }
 0x1e0   : > { %v1019_v4 = vadd.f32 %v1011_v52, %v946_v1  ;;  %v1020_v25 = vadd.f32 %v1012_v23, %v947_v58  ;;  %v1060_v13 = vmul.f32 %v2412_v31, %v1042_v41  ;;  %v1061_v34 = vmul.f32 %v2417_v19, %v1046_v11  ;;  %v2695_v41 = vld [vmem:[#allocation11_spill] sm:$0xff] }
 0x1e1   : > { %v508_v11 = vmul.f32 %v2695_v41, %v2694_v15 }
 0x1e2   : > { %v1084_v9 = vmul.f32 %v2691_v38, %v1060_v13  ;;  %v1085_v37 = vmul.f32 %v2691_v38, %v1061_v34  ;;  %v517_v51 = vpop.permute.xlu1 %516  ;;  %v1032_v18 = vpop.permute.xlu0 %1031 }
 0x1e4   : > { %v1092_v7 = vadd.f32 %v1084_v9, %v1019_v4  ;;  %v1093_v29 = vadd.f32 %v1085_v37, %v1020_v25  ;;  %v509_v4 = vmul.f32 %v2695_v41, %v2111_v22  ;;  %v2696_v25 = vld [vmem:[#allocation14_spill] sm:$0xff] }
 0x1e6   : > { %v592_v16 = vpop.permute.xlu1 %591 }
 0x1ea   : > { %v665_v35 = vpop.permute.xlu1 %664 }
 0x1ee   : > { %v738_v45 = vpop.permute.xlu1 %737 }
 0x1f2   : > { %v811_v57 = vpop.permute.xlu1 %810 }
 0x1f6   : > { %v884_v63 = vpop.permute.xlu1 %883 }
 0x1fa   : > { %v2429_v43 = vpop.permute.xlu1 %956 }
 0x1fe   : > { %v2431_v54 = vpop.permute.xlu1 %1029 }
 0x202   : > { %v525_v28 = vpop.permute.xlu1 %524 }
 0x203   : > { %v532_v30 = vsel %vm528_vm3, %v517_v51, %v525_v28  ;;  %v536_v50 = vsel %vm528_vm3, %v525_v28, %v517_v51 }
 0x204   : > { %v551_v17 = vmul.f32 %v2155_v53, %v536_v50  ;;  %v552_v49 = vmul.f32 %v2157_v42, %v532_v30 }
 0x206   : > { %v600_v8 = vpop.permute.xlu1 %599  ;;  %v575_v12 = vmul.f32 %v2692_v47, %v551_v17  ;;  %v576_v56 = vmul.f32 %v2692_v47, %v552_v49  ;;  %v2699_v17 = vld [vmem:[#allocation19_spill] sm:$0xff] }
 0x207   : > { %v605_v59 = vsel %vm601_vm4, %v592_v16, %v600_v8  ;;  %v609_v26 = vsel %vm601_vm4, %v600_v8, %v592_v16 }
 0x208   : > { %v624_v39 = vmul.f32 %v2178_v61, %v609_v26  ;;  %v625_v2 = vmul.f32 %v2180_v6, %v605_v59  ;;  %v2693_v61 = vld [vmem:[#allocation35_spill] sm:$0xff]  ;;  %v583_v22 = vadd.f32 %v575_v12, %v508_v11  ;;  %v2701_v12 = vld [vmem:[#allocation21_spill] sm:$0xff] }
 0x209   : > { %v1040_v6 = vsel %vm1039_vm9, %v2693_v61, %v1032_v18  ;;  %v1044_v52 = vsel %vm1039_vm9, %v1032_v18, %v2693_v61 }
 0x20a   : > { %v673_v14 = vpop.permute.xlu1 %672  ;;  %v648_v13 = vmul.f32 %v2696_v25, %v624_v39  ;;  %v649_v34 = vmul.f32 %v2696_v25, %v625_v2  ;;  %v1056_v51 = vmul.f32 %v2412_v31, %v1040_v6  ;;  %v1057_v16 = vmul.f32 %v2417_v19, %v1044_v52  ;;  %v2700_v39 = vld [vmem:[#allocation31_spill] sm:$0xff]  ;;  %v1098_v52 = vpop.permute.xlu0 %1097 }
 0x20b   : > { %v678_v36 = vsel %vm674_vm5, %v665_v35, %v673_v14  ;;  %v682_v1 = vsel %vm674_vm5, %v673_v14, %v665_v35  ;;  %v584_v35 = vadd.f32 %v576_v56, %v509_v4 }
 0x20c   : > { %v697_v23 = vmul.f32 %v2188_v21, %v682_v1  ;;  %v698_v62 = vmul.f32 %v2190_v5, %v678_v36  ;;  %v656_v50 = vadd.f32 %v648_v13, %v583_v22  ;;  %v1080_v2 = vmul.f32 %v2700_v39, %v1056_v51 }
 0x20d   : > { %v657_v14 = vadd.f32 %v649_v34, %v584_v35 }
 0x20e   : > { %v746_v58 = vpop.permute.xlu1 %745  ;;  %v1088_v4 = vadd.f32 %v1080_v2, %v2331_v40 }
 0x20f   : > { %v751_v53 = vsel %vm747_vm6, %v738_v45, %v746_v58  ;;  %v755_v42 = vsel %vm747_vm6, %v746_v58, %v738_v45  ;;  %v2697_v45 = vld [vmem:[#allocation34_spill] sm:$0xff] }
 0x210   : > { %v770_v9 = vmul.f32 %v2196_v60, %v755_v42  ;;  %v771_v37 = vmul.f32 %v2198_v44, %v751_v53  ;;  %v2478_v28 = vadd.f32 %v2697_v45, %v1092_v7  ;;  %v2481_v8 = vadd.f32 %v2697_v45, %v1093_v29  ;;  %v2698_v60 = vld [vmem:[#allocation17_spill] sm:$0xff] }
 0x211   : > { %v721_v44 = vmul.f32 %v2698_v60, %v697_v23  ;;  %v722_v30 = vmul.f32 %v2698_v60, %v698_v62  ;;  %v2702_v23 = vld [vmem:[#allocation24_spill] sm:$0xff]  ;;  %v2527_v35 = vadd.f32 %v1098_v52, %v1088_v4 }
 0x212   : > { %v819_v38 = vpop.permute.xlu1 %818  ;;  %v794_v49 = vmul.f32 %v2699_v17, %v770_v9  ;;  %v795_v18 = vmul.f32 %v2699_v17, %v771_v37  ;;  %v1133_v47 = vmul.f32 0.044715, %v2481_v8  ;;  %v1132_v61 = vmul.f32 0.044715, %v2478_v28  ;;  %v2703_v9 = vld [vmem:[#allocation26_spill] sm:$0xff] }
 0x213   : > { %v824_v21 = vsel %vm820_vm7, %v811_v57, %v819_v38  ;;  %v828_v5 = vsel %vm820_vm7, %v819_v38, %v811_v57  ;;  %v730_v58 = vadd.f32 %v722_v30, %v657_v14  ;;  %v2704_v30 = vld [vmem:[#allocation29_spill] sm:$0xff] }
 0x214   : > { %v843_v57 = vmul.f32 %v2214_v24, %v824_v21  ;;  %v844_v59 = vmul.f32 %v2219_v3, %v828_v5  ;;  %v1081_v24 = vmul.f32 %v2700_v39, %v1057_v16  ;;  %v729_v3 = vadd.f32 %v721_v44, %v656_v50  ;;  %v2705_v39 = vld [vmem:[#allocation33_spill] sm:$0xff] }
 0x215   : > { %v803_v6 = vadd.f32 %v795_v18, %v730_v58  ;;  %v1141_v13 = vmul.f32 %v1133_v47, %v2481_v8  ;;  %v1140_v40 = vmul.f32 %v1132_v61, %v2478_v28 }
 0x216   : > { %v892_v26 = vpop.permute.xlu1 %891  ;;  %v867_v56 = vmul.f32 %v2701_v12, %v843_v57  ;;  %v868_v53 = vmul.f32 %v2701_v12, %v844_v59  ;;  %v1089_v25 = vadd.f32 %v1081_v24, %v2333_v33  ;;  %v2706_v12 = vld [vmem:[#allocation32_spill] sm:$0xff] }
 0x217   : > { %v897_v7 = vsel %vm893_vm8, %v884_v63, %v892_v26  ;;  %v901_v29 = vsel %vm893_vm8, %v892_v26, %v884_v63  ;;  %v802_v63 = vadd.f32 %v794_v49, %v729_v3  ;;  %v1149_v45 = vmul.f32 %v1141_v13, %v2481_v8 }
 0x218   : > { %v916_v36 = vmul.f32 %v2221_v55, %v897_v7  ;;  %v917_v1 = vmul.f32 %v2225_v10, %v901_v29  ;;  %v876_v38 = vadd.f32 %v868_v53, %v803_v6  ;;  %v2516_v5 = vadd.f32 %v1098_v52, %v1089_v25 }
 0x219   : > { %v875_v34 = vadd.f32 %v867_v56, %v802_v63  ;;  %v1148_v26 = vmul.f32 %v1140_v40, %v2478_v28  ;;  %v1128_v7 = vmul.f32 0.044715, %v2527_v35  ;;  %v1157_v29 = vadd.f32 %v1149_v45, %v2481_v8 }
 0x21a   : > { %v965_v42 = vpop.permute.xlu1 %964  ;;  %v940_v62 = vmul.f32 %v2702_v23, %v916_v36  ;;  %v941_v15 = vmul.f32 %v2702_v23, %v917_v1  ;;  %v1129_v17 = vmul.f32 0.044715, %v2516_v5 }
 0x21b   : > { %v970_v55 = vsel %vm966_vm2, %v2429_v43, %v965_v42  ;;  %v974_v10 = vsel %vm966_vm2, %v965_v42, %v2429_v43  ;;  %v1156_v48 = vadd.f32 %v1148_v26, %v2478_v28  ;;  %v1136_v58 = vmul.f32 %v1128_v7, %v2527_v35 }
 0x21c   : > { %v989_v41 = vmul.f32 %v2150_v0, %v970_v55  ;;  %v990_v11 = vmul.f32 %v2163_v46, %v974_v10  ;;  %v948_v33 = vadd.f32 %v940_v62, %v875_v34  ;;  %v949_v51 = vadd.f32 %v941_v15, %v876_v38 }
 0x21d   : > { %v1165_v61 = vmul.f32 0.7978846, %v1157_v29  ;;  %v1164_v6 = vmul.f32 0.7978846, %v1156_v48 }
 0x21e   : > { %v1013_v37 = vmul.f32 %v2703_v9, %v989_v41  ;;  %v1014_v43 = vmul.f32 %v2703_v9, %v990_v11  ;;  %v1038_v21 = vpop.permute.xlu1 %1037 }
 0x21f   : > { %v1043_v0 = vsel %vm1039_vm9, %v2431_v54, %v1038_v21  ;;  %v1047_v46 = vsel %vm1039_vm9, %v1038_v21, %v2431_v54  ;;  %1561 = vtanh.f32 %v1165_v61 }
 0x220   : > { %v1062_v16 = vmul.f32 %v2412_v31, %v1043_v0  ;;  %v1063_v22 = vmul.f32 %v2417_v19, %v1047_v46  ;;  %v1021_v60 = vadd.f32 %v1013_v37, %v948_v33  ;;  %v1022_v44 = vadd.f32 %v1014_v43, %v949_v51 }
 0x221   : > { %1563 = vtanh.f32 %v1164_v6 }
 0x222   : > { %v1086_v50 = vmul.f32 %v2704_v30, %v1062_v16  ;;  %v1087_v14 = vmul.f32 %v2704_v30, %v1063_v22  ;;  %v1034_v57 = vpop.permute.xlu1 %1033 }
 0x223   : > { %v1041_v54 = vsel %vm1039_vm9, %v2329_v27, %v1034_v57  ;;  %v1045_v59 = vsel %vm1039_vm9, %v1034_v57, %v2329_v27  ;;  %v1137_v27 = vmul.f32 %v1129_v17, %v2516_v5 }
 0x224   : > { %v1094_v49 = vadd.f32 %v1086_v50, %v1021_v60  ;;  %v1095_v18 = vadd.f32 %v1087_v14, %v1022_v44  ;;  %v1058_v1 = vmul.f32 %v2412_v31, %v1041_v54  ;;  %v1059_v24 = vmul.f32 %v2417_v19, %v1045_v59 }
 0x225   : > { %v1145_v31 = vmul.f32 %v1137_v27, %v2516_v5  ;;  %v1144_v19 = vmul.f32 %v1136_v58, %v2527_v35  ;;  %v1125_v14 = vmul.f32 0.5, %v2481_v8  ;;  %v1124_v59 = vmul.f32 0.5, %v2478_v28 }
 0x226   : > { %v1118_v2 = vadd.f32 %v2705_v39, %v1094_v49  ;;  %v1119_v36 = vadd.f32 %v2705_v39, %v1095_v18  ;;  %v1082_v56 = vmul.f32 %v2706_v12, %v1058_v1  ;;  %v1083_v53 = vmul.f32 %v2706_v12, %v1059_v24 }
 0x227   : > { %v1153_v13 = vadd.f32 %v1145_v31, %v2516_v5  ;;  %v1152_v38 = vadd.f32 %v1144_v19, %v2527_v35 }
 0x228   : > { %v1135_v3 = vmul.f32 0.044715, %v1119_v36  ;;  %v1134_v47 = vmul.f32 0.044715, %v1118_v2  ;;  %v1090_v52 = vadd.f32 %v1082_v56, %v2357_v32  ;;  %v1091_v23 = vadd.f32 %v1083_v53, %v2359_v20 }
 0x229   : > { %v1161_v20 = vmul.f32 0.7978846, %v1153_v13  ;;  %v1160_v21 = vmul.f32 0.7978846, %v1152_v38  ;;  %v1127_v57 = vmul.f32 0.5, %v1119_v36  ;;  %v1126_v26 = vmul.f32 0.5, %v1118_v2 }
 0x22a   : > { %v1143_v42 = vmul.f32 %v1135_v3, %v1119_v36  ;;  %v1142_v63 = vmul.f32 %v1134_v47, %v1118_v2  ;;  %v1120_v47 = vmul.f32 0.5, %v2527_v35  ;;  %v1582_v35 = vld [vmem:[%s1823_s15] sm:$0xff] }
 0x22c   : > { %v1151_v55 = vmul.f32 %v1143_v42, %v1119_v36  ;;  %v1150_v10 = vmul.f32 %v1142_v63, %v1118_v2  ;;  %v1562_v22 = vpop.eup %1561 }
 0x22d   : > { %v1181_v60 = vadd.f32 1.0, %v1562_v22 }
 0x22e   : > { %v1159_v62 = vadd.f32 %v1151_v55, %v1119_v36  ;;  %v1158_v41 = vadd.f32 %v1150_v10, %v1118_v2  ;;  %v1564_v45 = vpop.eup %1563  ;;  %v1121_v36 = vmul.f32 0.5, %v2516_v5  ;;  %v1192_v55 = vld [vmem:[%s1816_s23] sm:$0xf]  ;;  %s1419_s23 = sshll.u32 %s1664_s22, 8  ;;  %s1698_s22 = smov [#allocation2]  }
 0x22f   : > { %v1102_v15 = vpop.permute.xlu1 %1101  ;;  %v1180_v30 = vadd.f32 1.0, %v1564_v45  ;;  %v1189_v49 = vmul.f32 %v1181_v60, %v1125_v14  ;;  %s1281_s24 = scalar_lea.hbm %s2618_s5, %s1419_s23  ;;  %s1588_s10 = sshll.u32 %s1698_s22, 4  ;;  %s1589_s10 = int_to_ptr.vmem [resolvable:$false] %s1588_s10 }
 0x230   : > { %v1114_v11 = vadd.f32 %v1102_v15, %v1090_v52  ;;  %v1115_v4 = vadd.f32 %v1102_v15, %v1091_v23  ;;  %v1167_v25 = vmul.f32 0.7978846, %v1159_v62  ;;  %v1166_v34 = vmul.f32 0.7978846, %v1158_v41  ;;  %s1590_s11 = scalar_lea.vmem %s1589_s10, 512  ;;  %p1591_p5 = scmp.lt.s32.totalorder %s1284_s12, %s1589_s10 }
 0x231   : > { %v1188_v7 = vmul.f32 %v1180_v30, %v1124_v59  ;;  %p1592_p6 = scmp.lt.s32.totalorder %s1590_s11, %s1584_s9 }
 0x232   : > { %v1130_v9 = vmul.f32 0.044715, %v1114_v11  ;;  %v1131_v37 = vmul.f32 0.044715, %v1115_v4  ;;  %1565 = vtanh.f32 %v1167_v25  ;;  %v1123_v28 = vmul.f32 0.5, %v1115_v4 }
 0x233   : > { %1567 = vtanh.f32 %v1166_v34  ;;  %v1122_v12 = vmul.f32 0.5, %v1114_v11  ;;  %p1593_p7 = por %p1592_p6, %p1591_p5 }
 0x234   : > { %v1138_v32 = vmul.f32 %v1130_v9, %v1114_v11  ;;  %v1139_v43 = vmul.f32 %v1131_v37, %v1115_v4  ;;  %1569 = vtanh.f32 %v1161_v20 }
 0x235   : > { %1571 = vtanh.f32 %v1160_v21  ;;  %p1594_p8 = pnand %p1593_p7, %p1587_p4 }
 0x236   : > { %v1146_v0 = vmul.f32 %v1138_v32, %v1114_v11  ;;  %v1147_v46 = vmul.f32 %v1139_v43, %v1115_v4 }
 0x238   : > { %v1155_v40 = vadd.f32 %v1147_v46, %v1115_v4  ;;  %v1154_v33 = vadd.f32 %v1146_v0, %v1114_v11  ;;  %v1583_v11 = vld [vmem:[%s1823_s15 + $0x8] sm:$0xff] }
 0x23a   : > { %v1163_v51 = vmul.f32 0.7978846, %v1155_v40  ;;  %v1162_v16 = vmul.f32 0.7978846, %v1154_v33 }
 0x23c   : > { %1573 = vtanh.f32 %v1163_v51 }
 0x23d   : > { %1575 = vtanh.f32 %v1162_v16 }
 0x23f   : > { %v1566_v44 = vpop.eup %1565 }
 0x240   : > { %v1568_v50 = vpop.eup %1567  ;;  %v1183_v54 = vadd.f32 1.0, %v1566_v44 }
 0x241   : > { %v1182_v17 = vadd.f32 1.0, %v1568_v50  ;;  %v1570_v1 = vpop.eup %1569 }
 0x242   : > { %v1191_v18 = vmul.f32 %v1183_v54, %v1127_v57  ;;  %v1572_v48 = vpop.eup %1571  ;;  %v1177_v27 = vadd.f32 1.0, %v1570_v1 }
 0x243   : > { %v1190_v29 = vmul.f32 %v1182_v17, %v1126_v26  ;;  %v1176_v58 = vadd.f32 1.0, %v1572_v48 }
 0x244   : > { %v1196_v39 = vpack.c.bf16 %v1191_v18, %v1189_v49  ;;  %v1185_v53 = vmul.f32 %v1177_v27, %v1121_v36 }
 0x245   : > { %v1195_v24 = vpack.c.bf16 %v1190_v29, %v1188_v7  ;;  %v1184_v61 = vmul.f32 %v1176_v58, %v1120_v47 }
 0x246   : > { %1217 = vmatprep.subr.bf16.mxu1 %v1196_v39 }
 0x247   : > { %1218 = vmatpush1.bf16.msra.mxu1 %v1195_v24 }
 0x248   : > { %v1199_v5 = vpop.permute.xlu0 %1198 }
 0x249   : > { %v1574_v3 = vpop.eup %1573 }
 0x24a   : > { %v1576_v8 = vpop.eup %1575  ;;  %v1179_v2 = vadd.f32 1.0, %v1574_v3 }
 0x24b   : > { %v1178_v56 = vadd.f32 1.0, %v1576_v8 }
 0x24c   : > { %v1187_v42 = vmul.f32 %v1179_v2, %v1123_v28 }
 0x24d   : > { %v1186_v63 = vmul.f32 %v1178_v56, %v1122_v12 }
 0x24e   : > { %v1194_v6 = vpack.c.bf16 %v1187_v42, %v1185_v53 }
 0x24f   : > { %v1193_v31 = vpack.c.bf16 %v1186_v63, %v1184_v61 }
 0x250   : > { %1219 = vmatprep.subr.bf16.mxu1 %v1194_v6 }
 0x251   : > { %1220 = vmatpush1.bf16.msra.mxu1 %v1193_v31 }
 0x254   : > { %1410 = vmatmul.mubr.msk.bf16.vlgmr.msra.gmra.mxu1 %vm1201_vm10, %v1192_v55 }
 0x314   : > { %v1239_v19 = vpop.f32.mrf.mxu1 }
 0x315   : > { %v1240_v10 = vadd.f32 %v1239_v19, %v1199_v5 }
 0x316   : > { %v1241_v52 = vpop.f32.mrf.mxu1 }
 0x317   : > { %v1246_v23 = vadd.f32 %v1582_v35, %v1240_v10  ;;  %v1242_v62 = vadd.f32 %v1241_v52, %v1199_v5 }
 0x318   : > { %v1243_v15 = vpop.f32.mrf.mxu1 }
 0x319   : > { %v1250_v41 = vmul.f32 0.044715, %v1246_v23  ;;  %v1247_v4 = vadd.f32 %v1583_v11, %v1242_v62  ;;  %v1248_v46 = vmul.f32 0.5, %v1246_v23 }
 0x31a   : > { %v1244_v25 = vpop.f32.mrf.mxu1 }
 0x31b   : > { %v1252_v13 = vmul.f32 %v1250_v41, %v1246_v23  ;;  %v1251_v34 = vmul.f32 0.044715, %v1247_v4  ;;  %v1249_v51 = vmul.f32 0.5, %v1247_v4 }
 0x31d   : > { %v1254_v38 = vmul.f32 %v1252_v13, %v1246_v23  ;;  %v1253_v9 = vmul.f32 %v1251_v34, %v1247_v4 }
 0x31f   : > { %v1255_v37 = vmul.f32 %v1253_v9, %v1247_v4  ;;  %v1256_v32 = vadd.f32 %v1254_v38, %v1246_v23 }
 0x321   : > { %v1257_v43 = vadd.f32 %v1255_v37, %v1247_v4  ;;  %v1258_v20 = vmul.f32 0.7978846, %v1256_v32 }
 0x323   : > { %v1259_v21 = vmul.f32 0.7978846, %v1257_v43  ;;  %1577 = vtanh.f32 %v1258_v20 }
 0x325   : > { %1579 = vtanh.f32 %v1259_v21 }
 0x330   : > { %v1578_v0 = vpop.eup %1577 }
 0x331   : > { %v1262_v40 = vadd.f32 1.0, %v1578_v0 }
 0x332   : > { %v1580_v33 = vpop.eup %1579 }
 0x333   : > { %v1263_v16 = vadd.f32 1.0, %v1580_v33  ;;  %v1264_v22 = vmul.f32 %v1262_v40, %v1248_v46 }
 0x335   : > { %v1265_v45 = vmul.f32 %v1263_v16, %v1249_v51  ;;  %1266 = vst [vmem:[%s1823_s15] sm:$0xff] %v1264_v22 }
 0x337   : > { %1267 = vst [vmem:[%s1823_s15 + $0x8] sm:$0xff] %v1265_v45 }
 0x338   : > { %1597 = shalt.err (!%p1594_p8)
}
 0x339   : > { %s1598_s13 = scalar_lea.hbm %s1281_s24, 256  ;;  %s1602_s16 = scalar_lea.hbm %s2618_s5, 512 }
 0x33a   : > { %p1599_p10 = scmp.ne.s32.totalorder %s1281_s24, %s1598_s13  ;;  %p1603_p13 = scmp.lt.s32.totalorder %s1281_s24, %s2618_s5 }
 0x33b   : > { %p1604_p0 = scmp.lt.s32.totalorder %s1602_s16, %s1598_s13 }
 0x33c   : > { %p1600_p11 = pnand %p1599_p10, %p1778_p3 }
 0x33d   : > { %p1605_p1 = por %p1604_p0, %p1603_p13 }
 0x33e   : > { %p1601_p12 = pneg %p1600_p11 }
 0x340   : > { %p1606_p2 = pnand %p1605_p1, %p1601_p12 }
 0x342   : > { %1609 = shalt.err (!%p1606_p2)
}
 0x343   : > { %1420 = dma.vmem_to_hbm [thread:$0]  (%p1778_p3), %s1284_s12, 256, %s1281_s24, %s1269_s29  }
 0x344 PF: > { %p1426_p4 = scmp.ge.s32.totalorder %s1676_s25, 2  ;;  %s1295_s27 = sand.u32 1, %s1648_s18  }
 0x345   : > { %s1296_s7 = scalar_lea.sflag [#allocation3], %s1295_s27 }
 0x346   : > { %p1423_p5 = pnand %p1426_p4, %p1788_p9 }
 0x348   : > { %p1424_p6 = pneg %p1423_p5 }
 0x34a   : > { %1643 = dma.done.wait (%p1424_p6), %s1296_s7, 256  }
 0x34b   : > { %1645 = vsyncadd (%p1424_p6), %s1296_s7, 4294967040  ;;  %s18_s25 = sadd.s32 1, %s1676_s25   ;;  %s2708_s8 = sld [smem:[#allocation5_spill]] }
 0x34c   : > { %p15_p7 = scmp.ge.s32.totalorder %s18_s25, 6   ;;  %s2709_s20 = sld [smem:[#allocation10_spill]] }
 0x34d   : > { %s2710_s21 = sld [smem:[#allocation6_spill]]  ;;  %s2714_s18 = smov %s1652_s19 }
 0x34e   : > { %s2711_s22 = sld [smem:[#allocation7_spill]]  ;;  %17 = sbr.rel (!%p15_p7) target bundleno = 5 (0x5), region = 88 }
 0x34f   : > { %s2712_s23 = sld [smem:[#allocation8_spill]] }
 0x350   : > { %s2713_s24 = sld [smem:[#allocation9_spill]] }
 0x351   : > { %s2715_s19 = smov %s2708_s8 }
 0x353   :  { %1301 = vsyncpa [#allocation3], 1 }
 0x354   :  { %1303 = vsyncpa [#allocation3 + $0x1], 1 }

</bundles_post_ra>
